<compile_context>
chip_gen: v6e
topology: v6e:2x2x1
jax: 0.10.0
libtpu: 0.0.40
codegen_flags: <defaults>
</compile_context>

<pallas_src>
import functools

import jax
import jax.numpy as jnp
from jax import lax
from jax.experimental import pallas as pl
from jax.experimental.pallas import tpu as pltpu


# ---------------------------------------------------------------------------
# Pallas kernel: one time-block of the fused bidirectional LSTM recurrence
# ---------------------------------------------------------------------------
def _bilstm_kernel(gxf_ref, gxb_ref, whhf_ref, whhb_ref,
                   outf_ref, outb_ref, state_scr, *, unroll):
    """Fused bidirectional LSTM recurrence over one time-block.

    gxf_ref : [TB, B, 4H] bf16  x@W_ih_f^T + (b_ih+b_hh), forward time order
    gxb_ref : [TB, B, 4H] bf16  same for the backward direction; its index_map
                                walks blocks back-to-front and rows are read
                                back-to-front inside the block
    whhf_ref, whhb_ref : [H, 4H] bf16  recurrent weights (already transposed)
    outf_ref: [TB, B, H] f32    forward hidden states (time order)
    outb_ref: [TB, B, H] f32    backward hidden states (time order)
    state_scr: [4, B, H] f32    (h_f, h_b, c_f, c_b), persists across blocks
    """
    tb = gxf_ref.shape[0]
    H = outf_ref.shape[-1]

    # h/c persist across grid steps -> zero only on the first time-block.
    @pl.when(pl.program_id(0) == 0)
    def _():
        state_scr[...] = jnp.zeros_like(state_scr)

    whh_f = whhf_ref[...]
    whh_b = whhb_ref[...]

    def cell(gates, c_prev):
        # NOTE: with H a multiple of 128 these slices are whole-vreg views;
        # at toy H they are intra-vreg lane extracts (acceptable at this size).
        i = jax.nn.sigmoid(gates[:, 0 * H:1 * H])
        f = jax.nn.sigmoid(gates[:, 1 * H:2 * H])
        g = jnp.tanh(gates[:, 2 * H:3 * H])
        o = jax.nn.sigmoid(gates[:, 3 * H:4 * H])
        c = f * c_prev + i * g          # f32 accumulate for the cell state
        h = o * jnp.tanh(c)
        return h, c

    def step(s, carry):
        h_f, h_b, c_f, c_b = carry      # register-carried state (no VMEM trip)
        rs = tb - 1 - s                 # backward direction walks the block
                                        # back-to-front
        gates_f = (jnp.dot(h_f.astype(whh_f.dtype), whh_f,
                           preferred_element_type=jnp.float32)
                   + gxf_ref[s].astype(jnp.float32))
        gates_b = (jnp.dot(h_b.astype(whh_b.dtype), whh_b,
                           preferred_element_type=jnp.float32)
                   + gxb_ref[rs].astype(jnp.float32))
        h_f, c_f = cell(gates_f, c_f)
        h_b, c_b = cell(gates_b, c_b)
        outf_ref[s] = h_f
        outb_ref[rs] = h_b
        return h_f, h_b, c_f, c_b

    init = (state_scr[0], state_scr[1], state_scr[2], state_scr[3])
    h_f, h_b, c_f, c_b = lax.fori_loop(0, tb, step, init, unroll=unroll)

    # Single scratch writeback per block.
    state_scr[0] = h_f
    state_scr[1] = h_b
    state_scr[2] = c_f
    state_scr[3] = c_b


# ---------------------------------------------------------------------------
# JAX wrappers (glue)
# ---------------------------------------------------------------------------
def _project_inputs(streams, w_ih, b_ih, b_hh):
    """Hoisted input projection: sum_s x_s @ W_ih_s^T + (b_ih + b_hh).

    `streams` are time-major [T, B, D_s]; their feature-concat is the layer
    input, but the concat is never materialized -- W_ih is split column-wise.
    One large batched bf16 dot per stream in XLA; result returned as bf16
    (halves the dominant VMEM/HBM buffer), gates re-expanded to f32 in-kernel.
    """
    wt = jnp.transpose(w_ih)                      # [D_total, 4H]
    gx = None
    off = 0
    for s in streams:
        d = s.shape[-1]
        part = jnp.einsum('tbd,dg->tbg',
                          s.astype(jnp.bfloat16),
                          wt[off:off + d].astype(jnp.bfloat16),
                          preferred_element_type=jnp.float32)
        gx = part if gx is None else gx + part
        off += d
    gx = gx + (b_ih + b_hh).astype(jnp.float32)   # bias folded in once
    return gx.astype(jnp.bfloat16)


def _pick_time_block(T, B, H, budget_bytes=8 << 20):
    """Largest divisor of T whose double-buffered gx/out blocks fit the budget
    (conservative enough for v5e's 16 MiB default scoped VMEM)."""
    G = 4 * H
    per_t = 2 * B * G * 2 + 2 * B * H * 4   # gx_f+gx_b (bf16) + out_f+out_b (f32)
    for tb in range(T, 0, -1):
        if T % tb == 0 and 2 * tb * per_t <= budget_bytes:
            return tb
    return 1


def bilstm_layer(streams, fwd_params, bwd_params):
    """One bidirectional LSTM layer over time-major input streams.

    Returns (out_f, out_b), each [T, B, H] f32 in time order.
    """
    T, B = streams[0].shape[:2]
    w_ih_f, w_hh_f, b_ih_f, b_hh_f = fwd_params
    w_ih_b, w_hh_b, b_ih_b, b_hh_b = bwd_params
    H = w_hh_f.shape[1]
    G = 4 * H

    gx_f = _project_inputs(streams, w_ih_f, b_ih_f, b_hh_f)   # [T, B, 4H] bf16
    gx_b = _project_inputs(streams, w_ih_b, b_ih_b, b_hh_b)   # [T, B, 4H] bf16

    whh_f = jnp.transpose(w_hh_f).astype(jnp.bfloat16)        # [H, 4H]
    whh_b = jnp.transpose(w_hh_b).astype(jnp.bfloat16)        # [H, 4H]

    tb = _pick_time_block(T, B, H)
    nb = T // tb

    # Explicit VMEM budget: double-buffered gx/out blocks + weights + state.
    per_t = 2 * B * G * 2 + 2 * B * H * 4
    need = 2 * tb * per_t + 2 * (2 * H * G * 2) + 4 * B * H * 4
    vmem_limit = int(min(max(4 * need, 8 << 20), 32 << 20))

    kernel = functools.partial(_bilstm_kernel, unroll=min(tb, 8))

    out_f, out_b = pl.pallas_call(
        kernel,
        out_shape=(
            jax.ShapeDtypeStruct((T, B, H), jnp.float32),
            jax.ShapeDtypeStruct((T, B, H), jnp.float32),
        ),
        grid=(nb,),
        in_specs=[
            # forward gx: blocks in forward time order
            pl.BlockSpec((tb, B, G), lambda i: (i, 0, 0)),
            # backward gx: blocks streamed back-to-front (reversal via
            # index_map -- no reversed copy in HBM)
            pl.BlockSpec((tb, B, G), lambda i: (nb - 1 - i, 0, 0)),
            # recurrent weights: resident (constant block index)
            pl.BlockSpec((H, G), lambda i: (0, 0)),
            pl.BlockSpec((H, G), lambda i: (0, 0)),
        ],
        out_specs=(
            pl.BlockSpec((tb, B, H), lambda i: (i, 0, 0)),
            pl.BlockSpec((tb, B, H), lambda i: (nb - 1 - i, 0, 0)),
        ),
        scratch_shapes=[
            pltpu.VMEM((4, B, H), jnp.float32),   # (h_f, h_b, c_f, c_b)
        ],
        compiler_params=pltpu.CompilerParams(
            dimension_semantics=("arbitrary",),   # serial recurrence over time
            vmem_limit_bytes=vmem_limit,
        ),
    )(gx_f, gx_b, whh_f, whh_b)
    return out_f, out_b


def rnn_forward(x_tokens, embedding, lstm_params, fc_w, fc_b):
    """Forward pass mirroring the PyTorch RNN module (eval-mode dropout)."""
    # Embedding gather stays in XLA; indices are transposed (cheap) so the
    # embedded sequence comes out directly time-major.
    emb_tbd = jnp.take(embedding, jnp.transpose(x_tokens), axis=0)   # [T, B, E]
    # dropout(p=0.5) on the embedding: identity (eval mode).
    streams = (emb_tbd.astype(jnp.float32),)

    out_f = out_b = None
    for layer in lstm_params:
        out_f, out_b = bilstm_layer(streams, layer["fwd"], layer["bwd"])
        # Next layer consumes [h_f || h_b]; keep as two time-major streams so
        # no concat / transpose is materialized between layers.
        streams = (out_f, out_b)
        # inter-layer LSTM dropout(0.5): identity (eval mode).

    # hidden = cat([hidden[-2], hidden[-1]], dim=1)
    #        = [h_f(T-1) || h_b after consuming x(0)] of the last layer.
    hidden = jnp.concatenate([out_f[-1], out_b[0]], axis=-1)          # [B, 2H]
    # dropout: identity.  Final FC (2H -> 1): trivial 1-lane matmul -> XLA.
    return (jnp.dot(hidden, jnp.transpose(fc_w).astype(jnp.float32))
            + fc_b.astype(jnp.float32))


# ---------------------------------------------------------------------------
# Deterministic parameter construction
# ---------------------------------------------------------------------------
def init_params(key, vocab, embedding_dim, hidden_dim, num_layers=2):
    keys = iter(jax.random.split(key, 64))
    bound = 1.0 / jnp.sqrt(hidden_dim)

    def u(shape):
        return jax.random.uniform(
            next(keys), shape, jnp.float32, minval=-bound, maxval=bound
        )

    embedding = jax.random.normal(next(keys), (vocab, embedding_dim), jnp.float32)

    lstm_params = []
    for layer in range(num_layers):
        d_in = embedding_dim if layer == 0 else 2 * hidden_dim
        layer_p = {}
        for direction in ("fwd", "bwd"):
            w_ih = u((4 * hidden_dim, d_in))
            w_hh = u((4 * hidden_dim, hidden_dim))
            b_ih = u((4 * hidden_dim,))
            b_hh = u((4 * hidden_dim,))
            layer_p[direction] = (w_ih, w_hh, b_ih, b_hh)
        lstm_params.append(layer_p)

    fc_w = u((1, 2 * hidden_dim))
    fc_b = u((1,))
    return embedding, lstm_params, fc_w, fc_b


# ---------------------------------------------------------------------------
if __name__ == "__main__":
    vocab = 20
    embedding_dim = 16
    hidden_dim = 32
    batch = 2
    seq = 8

    key = jax.random.PRNGKey(0)
    k_tok, k_par = jax.random.split(key)

    x_tokens = jax.random.randint(k_tok, (batch, seq), 0, vocab, dtype=jnp.int32)
    embedding, lstm_params, fc_w, fc_b = init_params(
        k_par, vocab, embedding_dim, hidden_dim
    )

    out = rnn_forward(x_tokens, embedding, lstm_params, fc_w, fc_b)
    out = jax.block_until_ready(out)
    assert out.shape == (batch, 1), out.shape
    print("KERNEL_OK")
</pallas_src>

<mosaic_0001>
module attributes {stable_mosaic.version = 11 : i64} {
  func.func @_bilstm_kernel(%arg0: i32, %arg1: memref<8x2x128xbf16, #tpu.memory_space<vmem>>, %arg2: memref<8x2x128xbf16, #tpu.memory_space<vmem>>, %arg3: memref<32x128xbf16, #tpu.memory_space<vmem>>, %arg4: memref<32x128xbf16, #tpu.memory_space<vmem>>, %arg5: memref<8x2x32xf32, #tpu.memory_space<vmem>>, %arg6: memref<8x2x32xf32, #tpu.memory_space<vmem>>, %arg7: memref<4x2x32xf32, #tpu.memory_space<vmem>>) attributes {dimension_semantics = [#tpu.dimension_semantics<arbitrary>], iteration_bounds = array<i64: 1>, scalar_prefetch = 0 : i64, scratch_operands = 1 : i64, tpu.core_type = #tpu.core_type<tc>, window_params = [{transform_indices = @transform_0, window_bounds = array<i64: 8, 2, 128>}, {transform_indices = @transform_1, window_bounds = array<i64: 8, 2, 128>}, {pipeline_mode = #tpu.pipeline_mode<synchronous>, transform_indices = @transform_2, window_bounds = array<i64: 32, 128>}, {pipeline_mode = #tpu.pipeline_mode<synchronous>, transform_indices = @transform_3, window_bounds = array<i64: 32, 128>}, {transform_indices = @transform_4, window_bounds = array<i64: 8, 2, 32>}, {transform_indices = @transform_5, window_bounds = array<i64: 8, 2, 32>}]} {
    %c0_i32 = arith.constant 0 : i32
    %0 = arith.cmpi eq, %arg0, %c0_i32 : i32
    %1 = arith.extui %0 : i1 to i32
    %c0_i32_0 = arith.constant 0 : i32
    %2 = arith.cmpi ne, %1, %c0_i32_0 : i32
    scf.if %2 {
      %cst_161 = arith.constant 0.000000e+00 : f32
      %609 = vector.broadcast %cst_161 : f32 to vector<4x2x32xf32>
      %c0_162 = arith.constant 0 : index
      %c0_163 = arith.constant 0 : index
      %c0_164 = arith.constant 0 : index
      %610 = vector.load %arg7[%c0_162, %c0_163, %c0_164] : memref<4x2x32xf32, #tpu.memory_space<vmem>>, vector<4x2x32xf32>
      tpu.vector_store %arg7[%c0_162, %c0_163, %c0_164], %609 {strides = array<i32>} : memref<4x2x32xf32, #tpu.memory_space<vmem>>, vector<4x2x32xf32>,
    } else {
    }
    %c0 = arith.constant 0 : index
    %c0_1 = arith.constant 0 : index
    %3 = vector.load %arg3[%c0, %c0_1] : memref<32x128xbf16, #tpu.memory_space<vmem>>, vector<32x128xbf16>
    %c0_2 = arith.constant 0 : index
    %c0_3 = arith.constant 0 : index
    %4 = vector.load %arg4[%c0_2, %c0_3] : memref<32x128xbf16, #tpu.memory_space<vmem>>, vector<32x128xbf16>
    %c0_4 = arith.constant 0 : index
    %c0_5 = arith.constant 0 : index
    %c0_6 = arith.constant 0 : index
    %5 = vector.load %arg7[%c0_4, %c0_5, %c0_6] : memref<4x2x32xf32, #tpu.memory_space<vmem>>, vector<1x2x32xf32>
    %6 = vector.shape_cast %5 : vector<1x2x32xf32> to vector<2x32xf32>
    %c1 = arith.constant 1 : index
    %c0_7 = arith.constant 0 : index
    %c0_8 = arith.constant 0 : index
    %7 = vector.load %arg7[%c1, %c0_7, %c0_8] : memref<4x2x32xf32, #tpu.memory_space<vmem>>, vector<1x2x32xf32>
    %8 = vector.shape_cast %7 : vector<1x2x32xf32> to vector<2x32xf32>
    %c2 = arith.constant 2 : index
    %c0_9 = arith.constant 0 : index
    %c0_10 = arith.constant 0 : index
    %9 = vector.load %arg7[%c2, %c0_9, %c0_10] : memref<4x2x32xf32, #tpu.memory_space<vmem>>, vector<1x2x32xf32>
    %10 = vector.shape_cast %9 : vector<1x2x32xf32> to vector<2x32xf32>
    %c3 = arith.constant 3 : index
    %c0_11 = arith.constant 0 : index
    %c0_12 = arith.constant 0 : index
    %11 = vector.load %arg7[%c3, %c0_11, %c0_12] : memref<4x2x32xf32, #tpu.memory_space<vmem>>, vector<1x2x32xf32>
    %12 = vector.shape_cast %11 : vector<1x2x32xf32> to vector<2x32xf32>
    %c0_i32_13 = arith.constant 0 : i32
    %c7_i32 = arith.constant 7 : i32
    %13 = arith.subi %c7_i32, %c0_i32_13 : i32
    %14 = arith.truncf %6 : vector<2x32xf32> to vector<2x32xbf16>
    %cst = arith.constant dense<0.000000e+00> : vector<2x128xf32>
    %15 = tpu.matmul %14, %3, %cst {dimension_numbers = #tpu.dot_dimension_numbers<[1], [0], [0], [1], [0, 0, 1, 1], [], []>} : vector<2x32xbf16>, vector<32x128xbf16>, vector<2x128xf32> -> vector<2x128xf32>
    %16 = arith.index_cast %c0_i32_13 : i32 to index
    %c0_14 = arith.constant 0 : index
    %c0_15 = arith.constant 0 : index
    %17 = vector.load %arg1[%16, %c0_14, %c0_15] : memref<8x2x128xbf16, #tpu.memory_space<vmem>>, vector<1x2x128xbf16>
    %18 = vector.shape_cast %17 : vector<1x2x128xbf16> to vector<2x128xbf16>
    %19 = arith.extf %18 : vector<2x128xbf16> to vector<2x128xf32>
    %20 = arith.addf %15, %19 : vector<2x128xf32>
    %21 = arith.truncf %8 : vector<2x32xf32> to vector<2x32xbf16>
    %cst_16 = arith.constant dense<0.000000e+00> : vector<2x128xf32>
    %22 = tpu.matmul %21, %4, %cst_16 {dimension_numbers = #tpu.dot_dimension_numbers<[1], [0], [0], [1], [0, 0, 1, 1], [], []>} : vector<2x32xbf16>, vector<32x128xbf16>, vector<2x128xf32> -> vector<2x128xf32>
    %23 = arith.index_cast %13 : i32 to index
    %c0_17 = arith.constant 0 : index
    %c0_18 = arith.constant 0 : index
    %24 = vector.load %arg2[%23, %c0_17, %c0_18] : memref<8x2x128xbf16, #tpu.memory_space<vmem>>, vector<1x2x128xbf16>
    %25 = vector.shape_cast %24 : vector<1x2x128xbf16> to vector<2x128xbf16>
    %26 = arith.extf %25 : vector<2x128xbf16> to vector<2x128xf32>
    %27 = arith.addf %22, %26 : vector<2x128xf32>
    %28 = vector.extract_strided_slice %20 {offsets = [0, 0], sizes = [2, 32], strides = [1, 1]} : vector<2x128xf32> to vector<2x32xf32>
    %29 = arith.negf %28 : vector<2x32xf32>
    %30 = math.exp %29 : vector<2x32xf32>
    %cst_19 = arith.constant 1.000000e+00 : f32
    %31 = vector.broadcast %cst_19 : f32 to vector<2x32xf32>
    %32 = arith.addf %31, %30 : vector<2x32xf32>
    %33 = arith.divf %31, %32 : vector<2x32xf32>
    %34 = vector.extract_strided_slice %20 {offsets = [0, 32], sizes = [2, 32], strides = [1, 1]} : vector<2x128xf32> to vector<2x32xf32>
    %35 = arith.negf %34 : vector<2x32xf32>
    %36 = math.exp %35 : vector<2x32xf32>
    %cst_20 = arith.constant 1.000000e+00 : f32
    %37 = vector.broadcast %cst_20 : f32 to vector<2x32xf32>
    %38 = arith.addf %37, %36 : vector<2x32xf32>
    %39 = arith.divf %37, %38 : vector<2x32xf32>
    %40 = vector.extract_strided_slice %20 {offsets = [0, 64], sizes = [2, 32], strides = [1, 1]} : vector<2x128xf32> to vector<2x32xf32>
    %41 = math.tanh %40 : vector<2x32xf32>
    %42 = vector.extract_strided_slice %20 {offsets = [0, 96], sizes = [2, 32], strides = [1, 1]} : vector<2x128xf32> to vector<2x32xf32>
    %43 = arith.negf %42 : vector<2x32xf32>
    %44 = math.exp %43 : vector<2x32xf32>
    %cst_21 = arith.constant 1.000000e+00 : f32
    %45 = vector.broadcast %cst_21 : f32 to vector<2x32xf32>
    %46 = arith.addf %45, %44 : vector<2x32xf32>
    %47 = arith.divf %45, %46 : vector<2x32xf32>
    %48 = arith.mulf %39, %10 : vector<2x32xf32>
    %49 = arith.mulf %33, %41 : vector<2x32xf32>
    %50 = arith.addf %48, %49 : vector<2x32xf32>
    %51 = math.tanh %50 : vector<2x32xf32>
    %52 = arith.mulf %47, %51 : vector<2x32xf32>
    %53 = vector.extract_strided_slice %27 {offsets = [0, 0], sizes = [2, 32], strides = [1, 1]} : vector<2x128xf32> to vector<2x32xf32>
    %54 = arith.negf %53 : vector<2x32xf32>
    %55 = math.exp %54 : vector<2x32xf32>
    %cst_22 = arith.constant 1.000000e+00 : f32
    %56 = vector.broadcast %cst_22 : f32 to vector<2x32xf32>
    %57 = arith.addf %56, %55 : vector<2x32xf32>
    %58 = arith.divf %56, %57 : vector<2x32xf32>
    %59 = vector.extract_strided_slice %27 {offsets = [0, 32], sizes = [2, 32], strides = [1, 1]} : vector<2x128xf32> to vector<2x32xf32>
    %60 = arith.negf %59 : vector<2x32xf32>
    %61 = math.exp %60 : vector<2x32xf32>
    %cst_23 = arith.constant 1.000000e+00 : f32
    %62 = vector.broadcast %cst_23 : f32 to vector<2x32xf32>
    %63 = arith.addf %62, %61 : vector<2x32xf32>
    %64 = arith.divf %62, %63 : vector<2x32xf32>
    %65 = vector.extract_strided_slice %27 {offsets = [0, 64], sizes = [2, 32], strides = [1, 1]} : vector<2x128xf32> to vector<2x32xf32>
    %66 = math.tanh %65 : vector<2x32xf32>
    %67 = vector.extract_strided_slice %27 {offsets = [0, 96], sizes = [2, 32], strides = [1, 1]} : vector<2x128xf32> to vector<2x32xf32>
    %68 = arith.negf %67 : vector<2x32xf32>
    %69 = math.exp %68 : vector<2x32xf32>
    %cst_24 = arith.constant 1.000000e+00 : f32
    %70 = vector.broadcast %cst_24 : f32 to vector<2x32xf32>
    %71 = arith.addf %70, %69 : vector<2x32xf32>
    %72 = arith.divf %70, %71 : vector<2x32xf32>
    %73 = arith.mulf %64, %12 : vector<2x32xf32>
    %74 = arith.mulf %58, %66 : vector<2x32xf32>
    %75 = arith.addf %73, %74 : vector<2x32xf32>
    %76 = math.tanh %75 : vector<2x32xf32>
    %77 = arith.mulf %72, %76 : vector<2x32xf32>
    %78 = arith.index_cast %c0_i32_13 : i32 to index
    %c0_25 = arith.constant 0 : index
    %c0_26 = arith.constant 0 : index
    %79 = vector.load %arg5[%78, %c0_25, %c0_26] : memref<8x2x32xf32, #tpu.memory_space<vmem>>, vector<1x2x32xf32>
    %80 = vector.shape_cast %79 : vector<1x2x32xf32> to vector<2x32xf32>
    %81 = vector.shape_cast %52 : vector<2x32xf32> to vector<1x2x32xf32>
    tpu.vector_store %arg5[%78, %c0_25, %c0_26], %81 {strides = array<i32>} : memref<8x2x32xf32, #tpu.memory_space<vmem>>, vector<1x2x32xf32>,
    %82 = arith.index_cast %13 : i32 to index
    %c0_27 = arith.constant 0 : index
    %c0_28 = arith.constant 0 : index
    %83 = vector.load %arg6[%82, %c0_27, %c0_28] : memref<8x2x32xf32, #tpu.memory_space<vmem>>, vector<1x2x32xf32>
    %84 = vector.shape_cast %83 : vector<1x2x32xf32> to vector<2x32xf32>
    %85 = vector.shape_cast %77 : vector<2x32xf32> to vector<1x2x32xf32>
    tpu.vector_store %arg6[%82, %c0_27, %c0_28], %85 {strides = array<i32>} : memref<8x2x32xf32, #tpu.memory_space<vmem>>, vector<1x2x32xf32>,
    %c1_i32 = arith.constant 1 : i32
    %c7_i32_29 = arith.constant 7 : i32
    %86 = arith.subi %c7_i32_29, %c1_i32 : i32
    %87 = arith.truncf %52 : vector<2x32xf32> to vector<2x32xbf16>
    %cst_30 = arith.constant dense<0.000000e+00> : vector<2x128xf32>
    %88 = tpu.matmul %87, %3, %cst_30 {dimension_numbers = #tpu.dot_dimension_numbers<[1], [0], [0], [1], [0, 0, 1, 1], [], []>} : vector<2x32xbf16>, vector<32x128xbf16>, vector<2x128xf32> -> vector<2x128xf32>
    %89 = arith.index_cast %c1_i32 : i32 to index
    %c0_31 = arith.constant 0 : index
    %c0_32 = arith.constant 0 : index
    %90 = vector.load %arg1[%89, %c0_31, %c0_32] : memref<8x2x128xbf16, #tpu.memory_space<vmem>>, vector<1x2x128xbf16>
    %91 = vector.shape_cast %90 : vector<1x2x128xbf16> to vector<2x128xbf16>
    %92 = arith.extf %91 : vector<2x128xbf16> to vector<2x128xf32>
    %93 = arith.addf %88, %92 : vector<2x128xf32>
    %94 = arith.truncf %77 : vector<2x32xf32> to vector<2x32xbf16>
    %cst_33 = arith.constant dense<0.000000e+00> : vector<2x128xf32>
    %95 = tpu.matmul %94, %4, %cst_33 {dimension_numbers = #tpu.dot_dimension_numbers<[1], [0], [0], [1], [0, 0, 1, 1], [], []>} : vector<2x32xbf16>, vector<32x128xbf16>, vector<2x128xf32> -> vector<2x128xf32>
    %96 = arith.index_cast %86 : i32 to index
    %c0_34 = arith.constant 0 : index
    %c0_35 = arith.constant 0 : index
    %97 = vector.load %arg2[%96, %c0_34, %c0_35] : memref<8x2x128xbf16, #tpu.memory_space<vmem>>, vector<1x2x128xbf16>
    %98 = vector.shape_cast %97 : vector<1x2x128xbf16> to vector<2x128xbf16>
    %99 = arith.extf %98 : vector<2x128xbf16> to vector<2x128xf32>
    %100 = arith.addf %95, %99 : vector<2x128xf32>
    %101 = vector.extract_strided_slice %93 {offsets = [0, 0], sizes = [2, 32], strides = [1, 1]} : vector<2x128xf32> to vector<2x32xf32>
    %102 = arith.negf %101 : vector<2x32xf32>
    %103 = math.exp %102 : vector<2x32xf32>
    %cst_36 = arith.constant 1.000000e+00 : f32
    %104 = vector.broadcast %cst_36 : f32 to vector<2x32xf32>
    %105 = arith.addf %104, %103 : vector<2x32xf32>
    %106 = arith.divf %104, %105 : vector<2x32xf32>
    %107 = vector.extract_strided_slice %93 {offsets = [0, 32], sizes = [2, 32], strides = [1, 1]} : vector<2x128xf32> to vector<2x32xf32>
    %108 = arith.negf %107 : vector<2x32xf32>
    %109 = math.exp %108 : vector<2x32xf32>
    %cst_37 = arith.constant 1.000000e+00 : f32
    %110 = vector.broadcast %cst_37 : f32 to vector<2x32xf32>
    %111 = arith.addf %110, %109 : vector<2x32xf32>
    %112 = arith.divf %110, %111 : vector<2x32xf32>
    %113 = vector.extract_strided_slice %93 {offsets = [0, 64], sizes = [2, 32], strides = [1, 1]} : vector<2x128xf32> to vector<2x32xf32>
    %114 = math.tanh %113 : vector<2x32xf32>
    %115 = vector.extract_strided_slice %93 {offsets = [0, 96], sizes = [2, 32], strides = [1, 1]} : vector<2x128xf32> to vector<2x32xf32>
    %116 = arith.negf %115 : vector<2x32xf32>
    %117 = math.exp %116 : vector<2x32xf32>
    %cst_38 = arith.constant 1.000000e+00 : f32
    %118 = vector.broadcast %cst_38 : f32 to vector<2x32xf32>
    %119 = arith.addf %118, %117 : vector<2x32xf32>
    %120 = arith.divf %118, %119 : vector<2x32xf32>
    %121 = arith.mulf %112, %50 : vector<2x32xf32>
    %122 = arith.mulf %106, %114 : vector<2x32xf32>
    %123 = arith.addf %121, %122 : vector<2x32xf32>
    %124 = math.tanh %123 : vector<2x32xf32>
    %125 = arith.mulf %120, %124 : vector<2x32xf32>
    %126 = vector.extract_strided_slice %100 {offsets = [0, 0], sizes = [2, 32], strides = [1, 1]} : vector<2x128xf32> to vector<2x32xf32>
    %127 = arith.negf %126 : vector<2x32xf32>
    %128 = math.exp %127 : vector<2x32xf32>
    %cst_39 = arith.constant 1.000000e+00 : f32
    %129 = vector.broadcast %cst_39 : f32 to vector<2x32xf32>
    %130 = arith.addf %129, %128 : vector<2x32xf32>
    %131 = arith.divf %129, %130 : vector<2x32xf32>
    %132 = vector.extract_strided_slice %100 {offsets = [0, 32], sizes = [2, 32], strides = [1, 1]} : vector<2x128xf32> to vector<2x32xf32>
    %133 = arith.negf %132 : vector<2x32xf32>
    %134 = math.exp %133 : vector<2x32xf32>
    %cst_40 = arith.constant 1.000000e+00 : f32
    %135 = vector.broadcast %cst_40 : f32 to vector<2x32xf32>
    %136 = arith.addf %135, %134 : vector<2x32xf32>
    %137 = arith.divf %135, %136 : vector<2x32xf32>
    %138 = vector.extract_strided_slice %100 {offsets = [0, 64], sizes = [2, 32], strides = [1, 1]} : vector<2x128xf32> to vector<2x32xf32>
    %139 = math.tanh %138 : vector<2x32xf32>
    %140 = vector.extract_strided_slice %100 {offsets = [0, 96], sizes = [2, 32], strides = [1, 1]} : vector<2x128xf32> to vector<2x32xf32>
    %141 = arith.negf %140 : vector<2x32xf32>
    %142 = math.exp %141 : vector<2x32xf32>
    %cst_41 = arith.constant 1.000000e+00 : f32
    %143 = vector.broadcast %cst_41 : f32 to vector<2x32xf32>
    %144 = arith.addf %143, %142 : vector<2x32xf32>
    %145 = arith.divf %143, %144 : vector<2x32xf32>
    %146 = arith.mulf %137, %75 : vector<2x32xf32>
    %147 = arith.mulf %131, %139 : vector<2x32xf32>
    %148 = arith.addf %146, %147 : vector<2x32xf32>
    %149 = math.tanh %148 : vector<2x32xf32>
    %150 = arith.mulf %145, %149 : vector<2x32xf32>
    %151 = arith.index_cast %c1_i32 : i32 to index
    %c0_42 = arith.constant 0 : index
    %c0_43 = arith.constant 0 : index
    %152 = vector.load %arg5[%151, %c0_42, %c0_43] : memref<8x2x32xf32, #tpu.memory_space<vmem>>, vector<1x2x32xf32>
    %153 = vector.shape_cast %152 : vector<1x2x32xf32> to vector<2x32xf32>
    %154 = vector.shape_cast %125 : vector<2x32xf32> to vector<1x2x32xf32>
    tpu.vector_store %arg5[%151, %c0_42, %c0_43], %154 {strides = array<i32>} : memref<8x2x32xf32, #tpu.memory_space<vmem>>, vector<1x2x32xf32>,
    %155 = arith.index_cast %86 : i32 to index
    %c0_44 = arith.constant 0 : index
    %c0_45 = arith.constant 0 : index
    %156 = vector.load %arg6[%155, %c0_44, %c0_45] : memref<8x2x32xf32, #tpu.memory_space<vmem>>, vector<1x2x32xf32>
    %157 = vector.shape_cast %156 : vector<1x2x32xf32> to vector<2x32xf32>
    %158 = vector.shape_cast %150 : vector<2x32xf32> to vector<1x2x32xf32>
    tpu.vector_store %arg6[%155, %c0_44, %c0_45], %158 {strides = array<i32>} : memref<8x2x32xf32, #tpu.memory_space<vmem>>, vector<1x2x32xf32>,
    %c2_i32 = arith.constant 2 : i32
    %c7_i32_46 = arith.constant 7 : i32
    %159 = arith.subi %c7_i32_46, %c2_i32 : i32
    %160 = arith.truncf %125 : vector<2x32xf32> to vector<2x32xbf16>
    %cst_47 = arith.constant dense<0.000000e+00> : vector<2x128xf32>
    %161 = tpu.matmul %160, %3, %cst_47 {dimension_numbers = #tpu.dot_dimension_numbers<[1], [0], [0], [1], [0, 0, 1, 1], [], []>} : vector<2x32xbf16>, vector<32x128xbf16>, vector<2x128xf32> -> vector<2x128xf32>
    %162 = arith.index_cast %c2_i32 : i32 to index
    %c0_48 = arith.constant 0 : index
    %c0_49 = arith.constant 0 : index
    %163 = vector.load %arg1[%162, %c0_48, %c0_49] : memref<8x2x128xbf16, #tpu.memory_space<vmem>>, vector<1x2x128xbf16>
    %164 = vector.shape_cast %163 : vector<1x2x128xbf16> to vector<2x128xbf16>
    %165 = arith.extf %164 : vector<2x128xbf16> to vector<2x128xf32>
    %166 = arith.addf %161, %165 : vector<2x128xf32>
    %167 = arith.truncf %150 : vector<2x32xf32> to vector<2x32xbf16>
    %cst_50 = arith.constant dense<0.000000e+00> : vector<2x128xf32>
    %168 = tpu.matmul %167, %4, %cst_50 {dimension_numbers = #tpu.dot_dimension_numbers<[1], [0], [0], [1], [0, 0, 1, 1], [], []>} : vector<2x32xbf16>, vector<32x128xbf16>, vector<2x128xf32> -> vector<2x128xf32>
    %169 = arith.index_cast %159 : i32 to index
    %c0_51 = arith.constant 0 : index
    %c0_52 = arith.constant 0 : index
    %170 = vector.load %arg2[%169, %c0_51, %c0_52] : memref<8x2x128xbf16, #tpu.memory_space<vmem>>, vector<1x2x128xbf16>
    %171 = vector.shape_cast %170 : vector<1x2x128xbf16> to vector<2x128xbf16>
    %172 = arith.extf %171 : vector<2x128xbf16> to vector<2x128xf32>
    %173 = arith.addf %168, %172 : vector<2x128xf32>
    %174 = vector.extract_strided_slice %166 {offsets = [0, 0], sizes = [2, 32], strides = [1, 1]} : vector<2x128xf32> to vector<2x32xf32>
    %175 = arith.negf %174 : vector<2x32xf32>
    %176 = math.exp %175 : vector<2x32xf32>
    %cst_53 = arith.constant 1.000000e+00 : f32
    %177 = vector.broadcast %cst_53 : f32 to vector<2x32xf32>
    %178 = arith.addf %177, %176 : vector<2x32xf32>
    %179 = arith.divf %177, %178 : vector<2x32xf32>
    %180 = vector.extract_strided_slice %166 {offsets = [0, 32], sizes = [2, 32], strides = [1, 1]} : vector<2x128xf32> to vector<2x32xf32>
    %181 = arith.negf %180 : vector<2x32xf32>
    %182 = math.exp %181 : vector<2x32xf32>
    %cst_54 = arith.constant 1.000000e+00 : f32
    %183 = vector.broadcast %cst_54 : f32 to vector<2x32xf32>
    %184 = arith.addf %183, %182 : vector<2x32xf32>
    %185 = arith.divf %183, %184 : vector<2x32xf32>
    %186 = vector.extract_strided_slice %166 {offsets = [0, 64], sizes = [2, 32], strides = [1, 1]} : vector<2x128xf32> to vector<2x32xf32>
    %187 = math.tanh %186 : vector<2x32xf32>
    %188 = vector.extract_strided_slice %166 {offsets = [0, 96], sizes = [2, 32], strides = [1, 1]} : vector<2x128xf32> to vector<2x32xf32>
    %189 = arith.negf %188 : vector<2x32xf32>
    %190 = math.exp %189 : vector<2x32xf32>
    %cst_55 = arith.constant 1.000000e+00 : f32
    %191 = vector.broadcast %cst_55 : f32 to vector<2x32xf32>
    %192 = arith.addf %191, %190 : vector<2x32xf32>
    %193 = arith.divf %191, %192 : vector<2x32xf32>
    %194 = arith.mulf %185, %123 : vector<2x32xf32>
    %195 = arith.mulf %179, %187 : vector<2x32xf32>
    %196 = arith.addf %194, %195 : vector<2x32xf32>
    %197 = math.tanh %196 : vector<2x32xf32>
    %198 = arith.mulf %193, %197 : vector<2x32xf32>
    %199 = vector.extract_strided_slice %173 {offsets = [0, 0], sizes = [2, 32], strides = [1, 1]} : vector<2x128xf32> to vector<2x32xf32>
    %200 = arith.negf %199 : vector<2x32xf32>
    %201 = math.exp %200 : vector<2x32xf32>
    %cst_56 = arith.constant 1.000000e+00 : f32
    %202 = vector.broadcast %cst_56 : f32 to vector<2x32xf32>
    %203 = arith.addf %202, %201 : vector<2x32xf32>
    %204 = arith.divf %202, %203 : vector<2x32xf32>
    %205 = vector.extract_strided_slice %173 {offsets = [0, 32], sizes = [2, 32], strides = [1, 1]} : vector<2x128xf32> to vector<2x32xf32>
    %206 = arith.negf %205 : vector<2x32xf32>
    %207 = math.exp %206 : vector<2x32xf32>
    %cst_57 = arith.constant 1.000000e+00 : f32
    %208 = vector.broadcast %cst_57 : f32 to vector<2x32xf32>
    %209 = arith.addf %208, %207 : vector<2x32xf32>
    %210 = arith.divf %208, %209 : vector<2x32xf32>
    %211 = vector.extract_strided_slice %173 {offsets = [0, 64], sizes = [2, 32], strides = [1, 1]} : vector<2x128xf32> to vector<2x32xf32>
    %212 = math.tanh %211 : vector<2x32xf32>
    %213 = vector.extract_strided_slice %173 {offsets = [0, 96], sizes = [2, 32], strides = [1, 1]} : vector<2x128xf32> to vector<2x32xf32>
    %214 = arith.negf %213 : vector<2x32xf32>
    %215 = math.exp %214 : vector<2x32xf32>
    %cst_58 = arith.constant 1.000000e+00 : f32
    %216 = vector.broadcast %cst_58 : f32 to vector<2x32xf32>
    %217 = arith.addf %216, %215 : vector<2x32xf32>
    %218 = arith.divf %216, %217 : vector<2x32xf32>
    %219 = arith.mulf %210, %148 : vector<2x32xf32>
    %220 = arith.mulf %204, %212 : vector<2x32xf32>
    %221 = arith.addf %219, %220 : vector<2x32xf32>
    %222 = math.tanh %221 : vector<2x32xf32>
    %223 = arith.mulf %218, %222 : vector<2x32xf32>
    %224 = arith.index_cast %c2_i32 : i32 to index
    %c0_59 = arith.constant 0 : index
    %c0_60 = arith.constant 0 : index
    %225 = vector.load %arg5[%224, %c0_59, %c0_60] : memref<8x2x32xf32, #tpu.memory_space<vmem>>, vector<1x2x32xf32>
    %226 = vector.shape_cast %225 : vector<1x2x32xf32> to vector<2x32xf32>
    %227 = vector.shape_cast %198 : vector<2x32xf32> to vector<1x2x32xf32>
    tpu.vector_store %arg5[%224, %c0_59, %c0_60], %227 {strides = array<i32>} : memref<8x2x32xf32, #tpu.memory_space<vmem>>, vector<1x2x32xf32>,
    %228 = arith.index_cast %159 : i32 to index
    %c0_61 = arith.constant 0 : index
    %c0_62 = arith.constant 0 : index
    %229 = vector.load %arg6[%228, %c0_61, %c0_62] : memref<8x2x32xf32, #tpu.memory_space<vmem>>, vector<1x2x32xf32>
    %230 = vector.shape_cast %229 : vector<1x2x32xf32> to vector<2x32xf32>
    %231 = vector.shape_cast %223 : vector<2x32xf32> to vector<1x2x32xf32>
    tpu.vector_store %arg6[%228, %c0_61, %c0_62], %231 {strides = array<i32>} : memref<8x2x32xf32, #tpu.memory_space<vmem>>, vector<1x2x32xf32>,
    %c3_i32 = arith.constant 3 : i32
    %c7_i32_63 = arith.constant 7 : i32
    %232 = arith.subi %c7_i32_63, %c3_i32 : i32
    %233 = arith.truncf %198 : vector<2x32xf32> to vector<2x32xbf16>
    %cst_64 = arith.constant dense<0.000000e+00> : vector<2x128xf32>
    %234 = tpu.matmul %233, %3, %cst_64 {dimension_numbers = #tpu.dot_dimension_numbers<[1], [0], [0], [1], [0, 0, 1, 1], [], []>} : vector<2x32xbf16>, vector<32x128xbf16>, vector<2x128xf32> -> vector<2x128xf32>
    %235 = arith.index_cast %c3_i32 : i32 to index
    %c0_65 = arith.constant 0 : index
    %c0_66 = arith.constant 0 : index
    %236 = vector.load %arg1[%235, %c0_65, %c0_66] : memref<8x2x128xbf16, #tpu.memory_space<vmem>>, vector<1x2x128xbf16>
    %237 = vector.shape_cast %236 : vector<1x2x128xbf16> to vector<2x128xbf16>
    %238 = arith.extf %237 : vector<2x128xbf16> to vector<2x128xf32>
    %239 = arith.addf %234, %238 : vector<2x128xf32>
    %240 = arith.truncf %223 : vector<2x32xf32> to vector<2x32xbf16>
    %cst_67 = arith.constant dense<0.000000e+00> : vector<2x128xf32>
    %241 = tpu.matmul %240, %4, %cst_67 {dimension_numbers = #tpu.dot_dimension_numbers<[1], [0], [0], [1], [0, 0, 1, 1], [], []>} : vector<2x32xbf16>, vector<32x128xbf16>, vector<2x128xf32> -> vector<2x128xf32>
    %242 = arith.index_cast %232 : i32 to index
    %c0_68 = arith.constant 0 : index
    %c0_69 = arith.constant 0 : index
    %243 = vector.load %arg2[%242, %c0_68, %c0_69] : memref<8x2x128xbf16, #tpu.memory_space<vmem>>, vector<1x2x128xbf16>
    %244 = vector.shape_cast %243 : vector<1x2x128xbf16> to vector<2x128xbf16>
    %245 = arith.extf %244 : vector<2x128xbf16> to vector<2x128xf32>
    %246 = arith.addf %241, %245 : vector<2x128xf32>
    %247 = vector.extract_strided_slice %239 {offsets = [0, 0], sizes = [2, 32], strides = [1, 1]} : vector<2x128xf32> to vector<2x32xf32>
    %248 = arith.negf %247 : vector<2x32xf32>
    %249 = math.exp %248 : vector<2x32xf32>
    %cst_70 = arith.constant 1.000000e+00 : f32
    %250 = vector.broadcast %cst_70 : f32 to vector<2x32xf32>
    %251 = arith.addf %250, %249 : vector<2x32xf32>
    %252 = arith.divf %250, %251 : vector<2x32xf32>
    %253 = vector.extract_strided_slice %239 {offsets = [0, 32], sizes = [2, 32], strides = [1, 1]} : vector<2x128xf32> to vector<2x32xf32>
    %254 = arith.negf %253 : vector<2x32xf32>
    %255 = math.exp %254 : vector<2x32xf32>
    %cst_71 = arith.constant 1.000000e+00 : f32
    %256 = vector.broadcast %cst_71 : f32 to vector<2x32xf32>
    %257 = arith.addf %256, %255 : vector<2x32xf32>
    %258 = arith.divf %256, %257 : vector<2x32xf32>
    %259 = vector.extract_strided_slice %239 {offsets = [0, 64], sizes = [2, 32], strides = [1, 1]} : vector<2x128xf32> to vector<2x32xf32>
    %260 = math.tanh %259 : vector<2x32xf32>
    %261 = vector.extract_strided_slice %239 {offsets = [0, 96], sizes = [2, 32], strides = [1, 1]} : vector<2x128xf32> to vector<2x32xf32>
    %262 = arith.negf %261 : vector<2x32xf32>
    %263 = math.exp %262 : vector<2x32xf32>
    %cst_72 = arith.constant 1.000000e+00 : f32
    %264 = vector.broadcast %cst_72 : f32 to vector<2x32xf32>
    %265 = arith.addf %264, %263 : vector<2x32xf32>
    %266 = arith.divf %264, %265 : vector<2x32xf32>
    %267 = arith.mulf %258, %196 : vector<2x32xf32>
    %268 = arith.mulf %252, %260 : vector<2x32xf32>
    %269 = arith.addf %267, %268 : vector<2x32xf32>
    %270 = math.tanh %269 : vector<2x32xf32>
    %271 = arith.mulf %266, %270 : vector<2x32xf32>
    %272 = vector.extract_strided_slice %246 {offsets = [0, 0], sizes = [2, 32], strides = [1, 1]} : vector<2x128xf32> to vector<2x32xf32>
    %273 = arith.negf %272 : vector<2x32xf32>
    %274 = math.exp %273 : vector<2x32xf32>
    %cst_73 = arith.constant 1.000000e+00 : f32
    %275 = vector.broadcast %cst_73 : f32 to vector<2x32xf32>
    %276 = arith.addf %275, %274 : vector<2x32xf32>
    %277 = arith.divf %275, %276 : vector<2x32xf32>
    %278 = vector.extract_strided_slice %246 {offsets = [0, 32], sizes = [2, 32], strides = [1, 1]} : vector<2x128xf32> to vector<2x32xf32>
    %279 = arith.negf %278 : vector<2x32xf32>
    %280 = math.exp %279 : vector<2x32xf32>
    %cst_74 = arith.constant 1.000000e+00 : f32
    %281 = vector.broadcast %cst_74 : f32 to vector<2x32xf32>
    %282 = arith.addf %281, %280 : vector<2x32xf32>
    %283 = arith.divf %281, %282 : vector<2x32xf32>
    %284 = vector.extract_strided_slice %246 {offsets = [0, 64], sizes = [2, 32], strides = [1, 1]} : vector<2x128xf32> to vector<2x32xf32>
    %285 = math.tanh %284 : vector<2x32xf32>
    %286 = vector.extract_strided_slice %246 {offsets = [0, 96], sizes = [2, 32], strides = [1, 1]} : vector<2x128xf32> to vector<2x32xf32>
    %287 = arith.negf %286 : vector<2x32xf32>
    %288 = math.exp %287 : vector<2x32xf32>
    %cst_75 = arith.constant 1.000000e+00 : f32
    %289 = vector.broadcast %cst_75 : f32 to vector<2x32xf32>
    %290 = arith.addf %289, %288 : vector<2x32xf32>
    %291 = arith.divf %289, %290 : vector<2x32xf32>
    %292 = arith.mulf %283, %221 : vector<2x32xf32>
    %293 = arith.mulf %277, %285 : vector<2x32xf32>
    %294 = arith.addf %292, %293 : vector<2x32xf32>
    %295 = math.tanh %294 : vector<2x32xf32>
    %296 = arith.mulf %291, %295 : vector<2x32xf32>
    %297 = arith.index_cast %c3_i32 : i32 to index
    %c0_76 = arith.constant 0 : index
    %c0_77 = arith.constant 0 : index
    %298 = vector.load %arg5[%297, %c0_76, %c0_77] : memref<8x2x32xf32, #tpu.memory_space<vmem>>, vector<1x2x32xf32>
    %299 = vector.shape_cast %298 : vector<1x2x32xf32> to vector<2x32xf32>
    %300 = vector.shape_cast %271 : vector<2x32xf32> to vector<1x2x32xf32>
    tpu.vector_store %arg5[%297, %c0_76, %c0_77], %300 {strides = array<i32>} : memref<8x2x32xf32, #tpu.memory_space<vmem>>, vector<1x2x32xf32>,
    %301 = arith.index_cast %232 : i32 to index
    %c0_78 = arith.constant 0 : index
    %c0_79 = arith.constant 0 : index
    %302 = vector.load %arg6[%301, %c0_78, %c0_79] : memref<8x2x32xf32, #tpu.memory_space<vmem>>, vector<1x2x32xf32>
    %303 = vector.shape_cast %302 : vector<1x2x32xf32> to vector<2x32xf32>
    %304 = vector.shape_cast %296 : vector<2x32xf32> to vector<1x2x32xf32>
    tpu.vector_store %arg6[%301, %c0_78, %c0_79], %304 {strides = array<i32>} : memref<8x2x32xf32, #tpu.memory_space<vmem>>, vector<1x2x32xf32>,
    %c4_i32 = arith.constant 4 : i32
    %c7_i32_80 = arith.constant 7 : i32
    %305 = arith.subi %c7_i32_80, %c4_i32 : i32
    %306 = arith.truncf %271 : vector<2x32xf32> to vector<2x32xbf16>
    %cst_81 = arith.constant dense<0.000000e+00> : vector<2x128xf32>
    %307 = tpu.matmul %306, %3, %cst_81 {dimension_numbers = #tpu.dot_dimension_numbers<[1], [0], [0], [1], [0, 0, 1, 1], [], []>} : vector<2x32xbf16>, vector<32x128xbf16>, vector<2x128xf32> -> vector<2x128xf32>
    %308 = arith.index_cast %c4_i32 : i32 to index
    %c0_82 = arith.constant 0 : index
    %c0_83 = arith.constant 0 : index
    %309 = vector.load %arg1[%308, %c0_82, %c0_83] : memref<8x2x128xbf16, #tpu.memory_space<vmem>>, vector<1x2x128xbf16>
    %310 = vector.shape_cast %309 : vector<1x2x128xbf16> to vector<2x128xbf16>
    %311 = arith.extf %310 : vector<2x128xbf16> to vector<2x128xf32>
    %312 = arith.addf %307, %311 : vector<2x128xf32>
    %313 = arith.truncf %296 : vector<2x32xf32> to vector<2x32xbf16>
    %cst_84 = arith.constant dense<0.000000e+00> : vector<2x128xf32>
    %314 = tpu.matmul %313, %4, %cst_84 {dimension_numbers = #tpu.dot_dimension_numbers<[1], [0], [0], [1], [0, 0, 1, 1], [], []>} : vector<2x32xbf16>, vector<32x128xbf16>, vector<2x128xf32> -> vector<2x128xf32>
    %315 = arith.index_cast %305 : i32 to index
    %c0_85 = arith.constant 0 : index
    %c0_86 = arith.constant 0 : index
    %316 = vector.load %arg2[%315, %c0_85, %c0_86] : memref<8x2x128xbf16, #tpu.memory_space<vmem>>, vector<1x2x128xbf16>
    %317 = vector.shape_cast %316 : vector<1x2x128xbf16> to vector<2x128xbf16>
    %318 = arith.extf %317 : vector<2x128xbf16> to vector<2x128xf32>
    %319 = arith.addf %314, %318 : vector<2x128xf32>
    %320 = vector.extract_strided_slice %312 {offsets = [0, 0], sizes = [2, 32], strides = [1, 1]} : vector<2x128xf32> to vector<2x32xf32>
    %321 = arith.negf %320 : vector<2x32xf32>
    %322 = math.exp %321 : vector<2x32xf32>
    %cst_87 = arith.constant 1.000000e+00 : f32
    %323 = vector.broadcast %cst_87 : f32 to vector<2x32xf32>
    %324 = arith.addf %323, %322 : vector<2x32xf32>
    %325 = arith.divf %323, %324 : vector<2x32xf32>
    %326 = vector.extract_strided_slice %312 {offsets = [0, 32], sizes = [2, 32], strides = [1, 1]} : vector<2x128xf32> to vector<2x32xf32>
    %327 = arith.negf %326 : vector<2x32xf32>
    %328 = math.exp %327 : vector<2x32xf32>
    %cst_88 = arith.constant 1.000000e+00 : f32
    %329 = vector.broadcast %cst_88 : f32 to vector<2x32xf32>
    %330 = arith.addf %329, %328 : vector<2x32xf32>
    %331 = arith.divf %329, %330 : vector<2x32xf32>
    %332 = vector.extract_strided_slice %312 {offsets = [0, 64], sizes = [2, 32], strides = [1, 1]} : vector<2x128xf32> to vector<2x32xf32>
    %333 = math.tanh %332 : vector<2x32xf32>
    %334 = vector.extract_strided_slice %312 {offsets = [0, 96], sizes = [2, 32], strides = [1, 1]} : vector<2x128xf32> to vector<2x32xf32>
    %335 = arith.negf %334 : vector<2x32xf32>
    %336 = math.exp %335 : vector<2x32xf32>
    %cst_89 = arith.constant 1.000000e+00 : f32
    %337 = vector.broadcast %cst_89 : f32 to vector<2x32xf32>
    %338 = arith.addf %337, %336 : vector<2x32xf32>
    %339 = arith.divf %337, %338 : vector<2x32xf32>
    %340 = arith.mulf %331, %269 : vector<2x32xf32>
    %341 = arith.mulf %325, %333 : vector<2x32xf32>
    %342 = arith.addf %340, %341 : vector<2x32xf32>
    %343 = math.tanh %342 : vector<2x32xf32>
    %344 = arith.mulf %339, %343 : vector<2x32xf32>
    %345 = vector.extract_strided_slice %319 {offsets = [0, 0], sizes = [2, 32], strides = [1, 1]} : vector<2x128xf32> to vector<2x32xf32>
    %346 = arith.negf %345 : vector<2x32xf32>
    %347 = math.exp %346 : vector<2x32xf32>
    %cst_90 = arith.constant 1.000000e+00 : f32
    %348 = vector.broadcast %cst_90 : f32 to vector<2x32xf32>
    %349 = arith.addf %348, %347 : vector<2x32xf32>
    %350 = arith.divf %348, %349 : vector<2x32xf32>
    %351 = vector.extract_strided_slice %319 {offsets = [0, 32], sizes = [2, 32], strides = [1, 1]} : vector<2x128xf32> to vector<2x32xf32>
    %352 = arith.negf %351 : vector<2x32xf32>
    %353 = math.exp %352 : vector<2x32xf32>
    %cst_91 = arith.constant 1.000000e+00 : f32
    %354 = vector.broadcast %cst_91 : f32 to vector<2x32xf32>
    %355 = arith.addf %354, %353 : vector<2x32xf32>
    %356 = arith.divf %354, %355 : vector<2x32xf32>
    %357 = vector.extract_strided_slice %319 {offsets = [0, 64], sizes = [2, 32], strides = [1, 1]} : vector<2x128xf32> to vector<2x32xf32>
    %358 = math.tanh %357 : vector<2x32xf32>
    %359 = vector.extract_strided_slice %319 {offsets = [0, 96], sizes = [2, 32], strides = [1, 1]} : vector<2x128xf32> to vector<2x32xf32>
    %360 = arith.negf %359 : vector<2x32xf32>
    %361 = math.exp %360 : vector<2x32xf32>
    %cst_92 = arith.constant 1.000000e+00 : f32
    %362 = vector.broadcast %cst_92 : f32 to vector<2x32xf32>
    %363 = arith.addf %362, %361 : vector<2x32xf32>
    %364 = arith.divf %362, %363 : vector<2x32xf32>
    %365 = arith.mulf %356, %294 : vector<2x32xf32>
    %366 = arith.mulf %350, %358 : vector<2x32xf32>
    %367 = arith.addf %365, %366 : vector<2x32xf32>
    %368 = math.tanh %367 : vector<2x32xf32>
    %369 = arith.mulf %364, %368 : vector<2x32xf32>
    %370 = arith.index_cast %c4_i32 : i32 to index
    %c0_93 = arith.constant 0 : index
    %c0_94 = arith.constant 0 : index
    %371 = vector.load %arg5[%370, %c0_93, %c0_94] : memref<8x2x32xf32, #tpu.memory_space<vmem>>, vector<1x2x32xf32>
    %372 = vector.shape_cast %371 : vector<1x2x32xf32> to vector<2x32xf32>
    %373 = vector.shape_cast %344 : vector<2x32xf32> to vector<1x2x32xf32>
    tpu.vector_store %arg5[%370, %c0_93, %c0_94], %373 {strides = array<i32>} : memref<8x2x32xf32, #tpu.memory_space<vmem>>, vector<1x2x32xf32>,
    %374 = arith.index_cast %305 : i32 to index
    %c0_95 = arith.constant 0 : index
    %c0_96 = arith.constant 0 : index
    %375 = vector.load %arg6[%374, %c0_95, %c0_96] : memref<8x2x32xf32, #tpu.memory_space<vmem>>, vector<1x2x32xf32>
    %376 = vector.shape_cast %375 : vector<1x2x32xf32> to vector<2x32xf32>
    %377 = vector.shape_cast %369 : vector<2x32xf32> to vector<1x2x32xf32>
    tpu.vector_store %arg6[%374, %c0_95, %c0_96], %377 {strides = array<i32>} : memref<8x2x32xf32, #tpu.memory_space<vmem>>, vector<1x2x32xf32>,
    %c5_i32 = arith.constant 5 : i32
    %c7_i32_97 = arith.constant 7 : i32
    %378 = arith.subi %c7_i32_97, %c5_i32 : i32
    %379 = arith.truncf %344 : vector<2x32xf32> to vector<2x32xbf16>
    %cst_98 = arith.constant dense<0.000000e+00> : vector<2x128xf32>
    %380 = tpu.matmul %379, %3, %cst_98 {dimension_numbers = #tpu.dot_dimension_numbers<[1], [0], [0], [1], [0, 0, 1, 1], [], []>} : vector<2x32xbf16>, vector<32x128xbf16>, vector<2x128xf32> -> vector<2x128xf32>
    %381 = arith.index_cast %c5_i32 : i32 to index
    %c0_99 = arith.constant 0 : index
    %c0_100 = arith.constant 0 : index
    %382 = vector.load %arg1[%381, %c0_99, %c0_100] : memref<8x2x128xbf16, #tpu.memory_space<vmem>>, vector<1x2x128xbf16>
    %383 = vector.shape_cast %382 : vector<1x2x128xbf16> to vector<2x128xbf16>
    %384 = arith.extf %383 : vector<2x128xbf16> to vector<2x128xf32>
    %385 = arith.addf %380, %384 : vector<2x128xf32>
    %386 = arith.truncf %369 : vector<2x32xf32> to vector<2x32xbf16>
    %cst_101 = arith.constant dense<0.000000e+00> : vector<2x128xf32>
    %387 = tpu.matmul %386, %4, %cst_101 {dimension_numbers = #tpu.dot_dimension_numbers<[1], [0], [0], [1], [0, 0, 1, 1], [], []>} : vector<2x32xbf16>, vector<32x128xbf16>, vector<2x128xf32> -> vector<2x128xf32>
    %388 = arith.index_cast %378 : i32 to index
    %c0_102 = arith.constant 0 : index
    %c0_103 = arith.constant 0 : index
    %389 = vector.load %arg2[%388, %c0_102, %c0_103] : memref<8x2x128xbf16, #tpu.memory_space<vmem>>, vector<1x2x128xbf16>
    %390 = vector.shape_cast %389 : vector<1x2x128xbf16> to vector<2x128xbf16>
    %391 = arith.extf %390 : vector<2x128xbf16> to vector<2x128xf32>
    %392 = arith.addf %387, %391 : vector<2x128xf32>
    %393 = vector.extract_strided_slice %385 {offsets = [0, 0], sizes = [2, 32], strides = [1, 1]} : vector<2x128xf32> to vector<2x32xf32>
    %394 = arith.negf %393 : vector<2x32xf32>
    %395 = math.exp %394 : vector<2x32xf32>
    %cst_104 = arith.constant 1.000000e+00 : f32
    %396 = vector.broadcast %cst_104 : f32 to vector<2x32xf32>
    %397 = arith.addf %396, %395 : vector<2x32xf32>
    %398 = arith.divf %396, %397 : vector<2x32xf32>
    %399 = vector.extract_strided_slice %385 {offsets = [0, 32], sizes = [2, 32], strides = [1, 1]} : vector<2x128xf32> to vector<2x32xf32>
    %400 = arith.negf %399 : vector<2x32xf32>
    %401 = math.exp %400 : vector<2x32xf32>
    %cst_105 = arith.constant 1.000000e+00 : f32
    %402 = vector.broadcast %cst_105 : f32 to vector<2x32xf32>
    %403 = arith.addf %402, %401 : vector<2x32xf32>
    %404 = arith.divf %402, %403 : vector<2x32xf32>
    %405 = vector.extract_strided_slice %385 {offsets = [0, 64], sizes = [2, 32], strides = [1, 1]} : vector<2x128xf32> to vector<2x32xf32>
    %406 = math.tanh %405 : vector<2x32xf32>
    %407 = vector.extract_strided_slice %385 {offsets = [0, 96], sizes = [2, 32], strides = [1, 1]} : vector<2x128xf32> to vector<2x32xf32>
    %408 = arith.negf %407 : vector<2x32xf32>
    %409 = math.exp %408 : vector<2x32xf32>
    %cst_106 = arith.constant 1.000000e+00 : f32
    %410 = vector.broadcast %cst_106 : f32 to vector<2x32xf32>
    %411 = arith.addf %410, %409 : vector<2x32xf32>
    %412 = arith.divf %410, %411 : vector<2x32xf32>
    %413 = arith.mulf %404, %342 : vector<2x32xf32>
    %414 = arith.mulf %398, %406 : vector<2x32xf32>
    %415 = arith.addf %413, %414 : vector<2x32xf32>
    %416 = math.tanh %415 : vector<2x32xf32>
    %417 = arith.mulf %412, %416 : vector<2x32xf32>
    %418 = vector.extract_strided_slice %392 {offsets = [0, 0], sizes = [2, 32], strides = [1, 1]} : vector<2x128xf32> to vector<2x32xf32>
    %419 = arith.negf %418 : vector<2x32xf32>
    %420 = math.exp %419 : vector<2x32xf32>
    %cst_107 = arith.constant 1.000000e+00 : f32
    %421 = vector.broadcast %cst_107 : f32 to vector<2x32xf32>
    %422 = arith.addf %421, %420 : vector<2x32xf32>
    %423 = arith.divf %421, %422 : vector<2x32xf32>
    %424 = vector.extract_strided_slice %392 {offsets = [0, 32], sizes = [2, 32], strides = [1, 1]} : vector<2x128xf32> to vector<2x32xf32>
    %425 = arith.negf %424 : vector<2x32xf32>
    %426 = math.exp %425 : vector<2x32xf32>
    %cst_108 = arith.constant 1.000000e+00 : f32
    %427 = vector.broadcast %cst_108 : f32 to vector<2x32xf32>
    %428 = arith.addf %427, %426 : vector<2x32xf32>
    %429 = arith.divf %427, %428 : vector<2x32xf32>
    %430 = vector.extract_strided_slice %392 {offsets = [0, 64], sizes = [2, 32], strides = [1, 1]} : vector<2x128xf32> to vector<2x32xf32>
    %431 = math.tanh %430 : vector<2x32xf32>
    %432 = vector.extract_strided_slice %392 {offsets = [0, 96], sizes = [2, 32], strides = [1, 1]} : vector<2x128xf32> to vector<2x32xf32>
    %433 = arith.negf %432 : vector<2x32xf32>
    %434 = math.exp %433 : vector<2x32xf32>
    %cst_109 = arith.constant 1.000000e+00 : f32
    %435 = vector.broadcast %cst_109 : f32 to vector<2x32xf32>
    %436 = arith.addf %435, %434 : vector<2x32xf32>
    %437 = arith.divf %435, %436 : vector<2x32xf32>
    %438 = arith.mulf %429, %367 : vector<2x32xf32>
    %439 = arith.mulf %423, %431 : vector<2x32xf32>
    %440 = arith.addf %438, %439 : vector<2x32xf32>
    %441 = math.tanh %440 : vector<2x32xf32>
    %442 = arith.mulf %437, %441 : vector<2x32xf32>
    %443 = arith.index_cast %c5_i32 : i32 to index
    %c0_110 = arith.constant 0 : index
    %c0_111 = arith.constant 0 : index
    %444 = vector.load %arg5[%443, %c0_110, %c0_111] : memref<8x2x32xf32, #tpu.memory_space<vmem>>, vector<1x2x32xf32>
    %445 = vector.shape_cast %444 : vector<1x2x32xf32> to vector<2x32xf32>
    %446 = vector.shape_cast %417 : vector<2x32xf32> to vector<1x2x32xf32>
    tpu.vector_store %arg5[%443, %c0_110, %c0_111], %446 {strides = array<i32>} : memref<8x2x32xf32, #tpu.memory_space<vmem>>, vector<1x2x32xf32>,
    %447 = arith.index_cast %378 : i32 to index
    %c0_112 = arith.constant 0 : index
    %c0_113 = arith.constant 0 : index
    %448 = vector.load %arg6[%447, %c0_112, %c0_113] : memref<8x2x32xf32, #tpu.memory_space<vmem>>, vector<1x2x32xf32>
    %449 = vector.shape_cast %448 : vector<1x2x32xf32> to vector<2x32xf32>
    %450 = vector.shape_cast %442 : vector<2x32xf32> to vector<1x2x32xf32>
    tpu.vector_store %arg6[%447, %c0_112, %c0_113], %450 {strides = array<i32>} : memref<8x2x32xf32, #tpu.memory_space<vmem>>, vector<1x2x32xf32>,
    %c6_i32 = arith.constant 6 : i32
    %c7_i32_114 = arith.constant 7 : i32
    %451 = arith.subi %c7_i32_114, %c6_i32 : i32
    %452 = arith.truncf %417 : vector<2x32xf32> to vector<2x32xbf16>
    %cst_115 = arith.constant dense<0.000000e+00> : vector<2x128xf32>
    %453 = tpu.matmul %452, %3, %cst_115 {dimension_numbers = #tpu.dot_dimension_numbers<[1], [0], [0], [1], [0, 0, 1, 1], [], []>} : vector<2x32xbf16>, vector<32x128xbf16>, vector<2x128xf32> -> vector<2x128xf32>
    %454 = arith.index_cast %c6_i32 : i32 to index
    %c0_116 = arith.constant 0 : index
    %c0_117 = arith.constant 0 : index
    %455 = vector.load %arg1[%454, %c0_116, %c0_117] : memref<8x2x128xbf16, #tpu.memory_space<vmem>>, vector<1x2x128xbf16>
    %456 = vector.shape_cast %455 : vector<1x2x128xbf16> to vector<2x128xbf16>
    %457 = arith.extf %456 : vector<2x128xbf16> to vector<2x128xf32>
    %458 = arith.addf %453, %457 : vector<2x128xf32>
    %459 = arith.truncf %442 : vector<2x32xf32> to vector<2x32xbf16>
    %cst_118 = arith.constant dense<0.000000e+00> : vector<2x128xf32>
    %460 = tpu.matmul %459, %4, %cst_118 {dimension_numbers = #tpu.dot_dimension_numbers<[1], [0], [0], [1], [0, 0, 1, 1], [], []>} : vector<2x32xbf16>, vector<32x128xbf16>, vector<2x128xf32> -> vector<2x128xf32>
    %461 = arith.index_cast %451 : i32 to index
    %c0_119 = arith.constant 0 : index
    %c0_120 = arith.constant 0 : index
    %462 = vector.load %arg2[%461, %c0_119, %c0_120] : memref<8x2x128xbf16, #tpu.memory_space<vmem>>, vector<1x2x128xbf16>
    %463 = vector.shape_cast %462 : vector<1x2x128xbf16> to vector<2x128xbf16>
    %464 = arith.extf %463 : vector<2x128xbf16> to vector<2x128xf32>
    %465 = arith.addf %460, %464 : vector<2x128xf32>
    %466 = vector.extract_strided_slice %458 {offsets = [0, 0], sizes = [2, 32], strides = [1, 1]} : vector<2x128xf32> to vector<2x32xf32>
    %467 = arith.negf %466 : vector<2x32xf32>
    %468 = math.exp %467 : vector<2x32xf32>
    %cst_121 = arith.constant 1.000000e+00 : f32
    %469 = vector.broadcast %cst_121 : f32 to vector<2x32xf32>
    %470 = arith.addf %469, %468 : vector<2x32xf32>
    %471 = arith.divf %469, %470 : vector<2x32xf32>
    %472 = vector.extract_strided_slice %458 {offsets = [0, 32], sizes = [2, 32], strides = [1, 1]} : vector<2x128xf32> to vector<2x32xf32>
    %473 = arith.negf %472 : vector<2x32xf32>
    %474 = math.exp %473 : vector<2x32xf32>
    %cst_122 = arith.constant 1.000000e+00 : f32
    %475 = vector.broadcast %cst_122 : f32 to vector<2x32xf32>
    %476 = arith.addf %475, %474 : vector<2x32xf32>
    %477 = arith.divf %475, %476 : vector<2x32xf32>
    %478 = vector.extract_strided_slice %458 {offsets = [0, 64], sizes = [2, 32], strides = [1, 1]} : vector<2x128xf32> to vector<2x32xf32>
    %479 = math.tanh %478 : vector<2x32xf32>
    %480 = vector.extract_strided_slice %458 {offsets = [0, 96], sizes = [2, 32], strides = [1, 1]} : vector<2x128xf32> to vector<2x32xf32>
    %481 = arith.negf %480 : vector<2x32xf32>
    %482 = math.exp %481 : vector<2x32xf32>
    %cst_123 = arith.constant 1.000000e+00 : f32
    %483 = vector.broadcast %cst_123 : f32 to vector<2x32xf32>
    %484 = arith.addf %483, %482 : vector<2x32xf32>
    %485 = arith.divf %483, %484 : vector<2x32xf32>
    %486 = arith.mulf %477, %415 : vector<2x32xf32>
    %487 = arith.mulf %471, %479 : vector<2x32xf32>
    %488 = arith.addf %486, %487 : vector<2x32xf32>
    %489 = math.tanh %488 : vector<2x32xf32>
    %490 = arith.mulf %485, %489 : vector<2x32xf32>
    %491 = vector.extract_strided_slice %465 {offsets = [0, 0], sizes = [2, 32], strides = [1, 1]} : vector<2x128xf32> to vector<2x32xf32>
    %492 = arith.negf %491 : vector<2x32xf32>
    %493 = math.exp %492 : vector<2x32xf32>
    %cst_124 = arith.constant 1.000000e+00 : f32
    %494 = vector.broadcast %cst_124 : f32 to vector<2x32xf32>
    %495 = arith.addf %494, %493 : vector<2x32xf32>
    %496 = arith.divf %494, %495 : vector<2x32xf32>
    %497 = vector.extract_strided_slice %465 {offsets = [0, 32], sizes = [2, 32], strides = [1, 1]} : vector<2x128xf32> to vector<2x32xf32>
    %498 = arith.negf %497 : vector<2x32xf32>
    %499 = math.exp %498 : vector<2x32xf32>
    %cst_125 = arith.constant 1.000000e+00 : f32
    %500 = vector.broadcast %cst_125 : f32 to vector<2x32xf32>
    %501 = arith.addf %500, %499 : vector<2x32xf32>
    %502 = arith.divf %500, %501 : vector<2x32xf32>
    %503 = vector.extract_strided_slice %465 {offsets = [0, 64], sizes = [2, 32], strides = [1, 1]} : vector<2x128xf32> to vector<2x32xf32>
    %504 = math.tanh %503 : vector<2x32xf32>
    %505 = vector.extract_strided_slice %465 {offsets = [0, 96], sizes = [2, 32], strides = [1, 1]} : vector<2x128xf32> to vector<2x32xf32>
    %506 = arith.negf %505 : vector<2x32xf32>
    %507 = math.exp %506 : vector<2x32xf32>
    %cst_126 = arith.constant 1.000000e+00 : f32
    %508 = vector.broadcast %cst_126 : f32 to vector<2x32xf32>
    %509 = arith.addf %508, %507 : vector<2x32xf32>
    %510 = arith.divf %508, %509 : vector<2x32xf32>
    %511 = arith.mulf %502, %440 : vector<2x32xf32>
    %512 = arith.mulf %496, %504 : vector<2x32xf32>
    %513 = arith.addf %511, %512 : vector<2x32xf32>
    %514 = math.tanh %513 : vector<2x32xf32>
    %515 = arith.mulf %510, %514 : vector<2x32xf32>
    %516 = arith.index_cast %c6_i32 : i32 to index
    %c0_127 = arith.constant 0 : index
    %c0_128 = arith.constant 0 : index
    %517 = vector.load %arg5[%516, %c0_127, %c0_128] : memref<8x2x32xf32, #tpu.memory_space<vmem>>, vector<1x2x32xf32>
    %518 = vector.shape_cast %517 : vector<1x2x32xf32> to vector<2x32xf32>
    %519 = vector.shape_cast %490 : vector<2x32xf32> to vector<1x2x32xf32>
    tpu.vector_store %arg5[%516, %c0_127, %c0_128], %519 {strides = array<i32>} : memref<8x2x32xf32, #tpu.memory_space<vmem>>, vector<1x2x32xf32>,
    %520 = arith.index_cast %451 : i32 to index
    %c0_129 = arith.constant 0 : index
    %c0_130 = arith.constant 0 : index
    %521 = vector.load %arg6[%520, %c0_129, %c0_130] : memref<8x2x32xf32, #tpu.memory_space<vmem>>, vector<1x2x32xf32>
    %522 = vector.shape_cast %521 : vector<1x2x32xf32> to vector<2x32xf32>
    %523 = vector.shape_cast %515 : vector<2x32xf32> to vector<1x2x32xf32>
    tpu.vector_store %arg6[%520, %c0_129, %c0_130], %523 {strides = array<i32>} : memref<8x2x32xf32, #tpu.memory_space<vmem>>, vector<1x2x32xf32>,
    %c7_i32_131 = arith.constant 7 : i32
    %c7_i32_132 = arith.constant 7 : i32
    %524 = arith.subi %c7_i32_132, %c7_i32_131 : i32
    %525 = arith.truncf %490 : vector<2x32xf32> to vector<2x32xbf16>
    %cst_133 = arith.constant dense<0.000000e+00> : vector<2x128xf32>
    %526 = tpu.matmul %525, %3, %cst_133 {dimension_numbers = #tpu.dot_dimension_numbers<[1], [0], [0], [1], [0, 0, 1, 1], [], []>} : vector<2x32xbf16>, vector<32x128xbf16>, vector<2x128xf32> -> vector<2x128xf32>
    %527 = arith.index_cast %c7_i32_131 : i32 to index
    %c0_134 = arith.constant 0 : index
    %c0_135 = arith.constant 0 : index
    %528 = vector.load %arg1[%527, %c0_134, %c0_135] : memref<8x2x128xbf16, #tpu.memory_space<vmem>>, vector<1x2x128xbf16>
    %529 = vector.shape_cast %528 : vector<1x2x128xbf16> to vector<2x128xbf16>
    %530 = arith.extf %529 : vector<2x128xbf16> to vector<2x128xf32>
    %531 = arith.addf %526, %530 : vector<2x128xf32>
    %532 = arith.truncf %515 : vector<2x32xf32> to vector<2x32xbf16>
    %cst_136 = arith.constant dense<0.000000e+00> : vector<2x128xf32>
    %533 = tpu.matmul %532, %4, %cst_136 {dimension_numbers = #tpu.dot_dimension_numbers<[1], [0], [0], [1], [0, 0, 1, 1], [], []>} : vector<2x32xbf16>, vector<32x128xbf16>, vector<2x128xf32> -> vector<2x128xf32>
    %534 = arith.index_cast %524 : i32 to index
    %c0_137 = arith.constant 0 : index
    %c0_138 = arith.constant 0 : index
    %535 = vector.load %arg2[%534, %c0_137, %c0_138] : memref<8x2x128xbf16, #tpu.memory_space<vmem>>, vector<1x2x128xbf16>
    %536 = vector.shape_cast %535 : vector<1x2x128xbf16> to vector<2x128xbf16>
    %537 = arith.extf %536 : vector<2x128xbf16> to vector<2x128xf32>
    %538 = arith.addf %533, %537 : vector<2x128xf32>
    %539 = vector.extract_strided_slice %531 {offsets = [0, 0], sizes = [2, 32], strides = [1, 1]} : vector<2x128xf32> to vector<2x32xf32>
    %540 = arith.negf %539 : vector<2x32xf32>
    %541 = math.exp %540 : vector<2x32xf32>
    %cst_139 = arith.constant 1.000000e+00 : f32
    %542 = vector.broadcast %cst_139 : f32 to vector<2x32xf32>
    %543 = arith.addf %542, %541 : vector<2x32xf32>
    %544 = arith.divf %542, %543 : vector<2x32xf32>
    %545 = vector.extract_strided_slice %531 {offsets = [0, 32], sizes = [2, 32], strides = [1, 1]} : vector<2x128xf32> to vector<2x32xf32>
    %546 = arith.negf %545 : vector<2x32xf32>
    %547 = math.exp %546 : vector<2x32xf32>
    %cst_140 = arith.constant 1.000000e+00 : f32
    %548 = vector.broadcast %cst_140 : f32 to vector<2x32xf32>
    %549 = arith.addf %548, %547 : vector<2x32xf32>
    %550 = arith.divf %548, %549 : vector<2x32xf32>
    %551 = vector.extract_strided_slice %531 {offsets = [0, 64], sizes = [2, 32], strides = [1, 1]} : vector<2x128xf32> to vector<2x32xf32>
    %552 = math.tanh %551 : vector<2x32xf32>
    %553 = vector.extract_strided_slice %531 {offsets = [0, 96], sizes = [2, 32], strides = [1, 1]} : vector<2x128xf32> to vector<2x32xf32>
    %554 = arith.negf %553 : vector<2x32xf32>
    %555 = math.exp %554 : vector<2x32xf32>
    %cst_141 = arith.constant 1.000000e+00 : f32
    %556 = vector.broadcast %cst_141 : f32 to vector<2x32xf32>
    %557 = arith.addf %556, %555 : vector<2x32xf32>
    %558 = arith.divf %556, %557 : vector<2x32xf32>
    %559 = arith.mulf %550, %488 : vector<2x32xf32>
    %560 = arith.mulf %544, %552 : vector<2x32xf32>
    %561 = arith.addf %559, %560 : vector<2x32xf32>
    %562 = math.tanh %561 : vector<2x32xf32>
    %563 = arith.mulf %558, %562 : vector<2x32xf32>
    %564 = vector.extract_strided_slice %538 {offsets = [0, 0], sizes = [2, 32], strides = [1, 1]} : vector<2x128xf32> to vector<2x32xf32>
    %565 = arith.negf %564 : vector<2x32xf32>
    %566 = math.exp %565 : vector<2x32xf32>
    %cst_142 = arith.constant 1.000000e+00 : f32
    %567 = vector.broadcast %cst_142 : f32 to vector<2x32xf32>
    %568 = arith.addf %567, %566 : vector<2x32xf32>
    %569 = arith.divf %567, %568 : vector<2x32xf32>
    %570 = vector.extract_strided_slice %538 {offsets = [0, 32], sizes = [2, 32], strides = [1, 1]} : vector<2x128xf32> to vector<2x32xf32>
    %571 = arith.negf %570 : vector<2x32xf32>
    %572 = math.exp %571 : vector<2x32xf32>
    %cst_143 = arith.constant 1.000000e+00 : f32
    %573 = vector.broadcast %cst_143 : f32 to vector<2x32xf32>
    %574 = arith.addf %573, %572 : vector<2x32xf32>
    %575 = arith.divf %573, %574 : vector<2x32xf32>
    %576 = vector.extract_strided_slice %538 {offsets = [0, 64], sizes = [2, 32], strides = [1, 1]} : vector<2x128xf32> to vector<2x32xf32>
    %577 = math.tanh %576 : vector<2x32xf32>
    %578 = vector.extract_strided_slice %538 {offsets = [0, 96], sizes = [2, 32], strides = [1, 1]} : vector<2x128xf32> to vector<2x32xf32>
    %579 = arith.negf %578 : vector<2x32xf32>
    %580 = math.exp %579 : vector<2x32xf32>
    %cst_144 = arith.constant 1.000000e+00 : f32
    %581 = vector.broadcast %cst_144 : f32 to vector<2x32xf32>
    %582 = arith.addf %581, %580 : vector<2x32xf32>
    %583 = arith.divf %581, %582 : vector<2x32xf32>
    %584 = arith.mulf %575, %513 : vector<2x32xf32>
    %585 = arith.mulf %569, %577 : vector<2x32xf32>
    %586 = arith.addf %584, %585 : vector<2x32xf32>
    %587 = math.tanh %586 : vector<2x32xf32>
    %588 = arith.mulf %583, %587 : vector<2x32xf32>
    %589 = arith.index_cast %c7_i32_131 : i32 to index
    %c0_145 = arith.constant 0 : index
    %c0_146 = arith.constant 0 : index
    %590 = vector.load %arg5[%589, %c0_145, %c0_146] : memref<8x2x32xf32, #tpu.memory_space<vmem>>, vector<1x2x32xf32>
    %591 = vector.shape_cast %590 : vector<1x2x32xf32> to vector<2x32xf32>
    %592 = vector.shape_cast %563 : vector<2x32xf32> to vector<1x2x32xf32>
    tpu.vector_store %arg5[%589, %c0_145, %c0_146], %592 {strides = array<i32>} : memref<8x2x32xf32, #tpu.memory_space<vmem>>, vector<1x2x32xf32>,
    %593 = arith.index_cast %524 : i32 to index
    %c0_147 = arith.constant 0 : index
    %c0_148 = arith.constant 0 : index
    %594 = vector.load %arg6[%593, %c0_147, %c0_148] : memref<8x2x32xf32, #tpu.memory_space<vmem>>, vector<1x2x32xf32>
    %595 = vector.shape_cast %594 : vector<1x2x32xf32> to vector<2x32xf32>
    %596 = vector.shape_cast %588 : vector<2x32xf32> to vector<1x2x32xf32>
    tpu.vector_store %arg6[%593, %c0_147, %c0_148], %596 {strides = array<i32>} : memref<8x2x32xf32, #tpu.memory_space<vmem>>, vector<1x2x32xf32>,
    %c8_i32 = arith.constant 8 : i32
    %c0_149 = arith.constant 0 : index
    %c0_150 = arith.constant 0 : index
    %c0_151 = arith.constant 0 : index
    %597 = vector.load %arg7[%c0_149, %c0_150, %c0_151] : memref<4x2x32xf32, #tpu.memory_space<vmem>>, vector<1x2x32xf32>
    %598 = vector.shape_cast %597 : vector<1x2x32xf32> to vector<2x32xf32>
    %599 = vector.shape_cast %563 : vector<2x32xf32> to vector<1x2x32xf32>
    tpu.vector_store %arg7[%c0_149, %c0_150, %c0_151], %599 {strides = array<i32>} : memref<4x2x32xf32, #tpu.memory_space<vmem>>, vector<1x2x32xf32>,
    %c1_152 = arith.constant 1 : index
    %c0_153 = arith.constant 0 : index
    %c0_154 = arith.constant 0 : index
    %600 = vector.load %arg7[%c1_152, %c0_153, %c0_154] : memref<4x2x32xf32, #tpu.memory_space<vmem>>, vector<1x2x32xf32>
    %601 = vector.shape_cast %600 : vector<1x2x32xf32> to vector<2x32xf32>
    %602 = vector.shape_cast %588 : vector<2x32xf32> to vector<1x2x32xf32>
    tpu.vector_store %arg7[%c1_152, %c0_153, %c0_154], %602 {strides = array<i32>} : memref<4x2x32xf32, #tpu.memory_space<vmem>>, vector<1x2x32xf32>,
    %c2_155 = arith.constant 2 : index
    %c0_156 = arith.constant 0 : index
    %c0_157 = arith.constant 0 : index
    %603 = vector.load %arg7[%c2_155, %c0_156, %c0_157] : memref<4x2x32xf32, #tpu.memory_space<vmem>>, vector<1x2x32xf32>
    %604 = vector.shape_cast %603 : vector<1x2x32xf32> to vector<2x32xf32>
    %605 = vector.shape_cast %561 : vector<2x32xf32> to vector<1x2x32xf32>
    tpu.vector_store %arg7[%c2_155, %c0_156, %c0_157], %605 {strides = array<i32>} : memref<4x2x32xf32, #tpu.memory_space<vmem>>, vector<1x2x32xf32>,
    %c3_158 = arith.constant 3 : index
    %c0_159 = arith.constant 0 : index
    %c0_160 = arith.constant 0 : index
    %606 = vector.load %arg7[%c3_158, %c0_159, %c0_160] : memref<4x2x32xf32, #tpu.memory_space<vmem>>, vector<1x2x32xf32>
    %607 = vector.shape_cast %606 : vector<1x2x32xf32> to vector<2x32xf32>
    %608 = vector.shape_cast %586 : vector<2x32xf32> to vector<1x2x32xf32>
    tpu.vector_store %arg7[%c3_158, %c0_159, %c0_160], %608 {strides = array<i32>} : memref<4x2x32xf32, #tpu.memory_space<vmem>>, vector<1x2x32xf32>,
    return
  }
  func.func @transform_0(%arg0: i32) -> (i32, i32, i32) {
    %c0_i32 = arith.constant 0 : i32
    %c0_i32_0 = arith.constant 0 : i32
    %c0_i32_1 = arith.constant 0 : i32
    return %arg0, %c0_i32, %c0_i32_0 : i32, i32, i32
  }
  func.func @transform_1(%arg0: i32) -> (i32, i32, i32) {
    %c0_i32 = arith.constant 0 : i32
    %0 = arith.subi %c0_i32, %arg0 : i32
    %c0_i32_0 = arith.constant 0 : i32
    %c0_i32_1 = arith.constant 0 : i32
    %c0_i32_2 = arith.constant 0 : i32
    return %0, %c0_i32_0, %c0_i32_1 : i32, i32, i32
  }
  func.func @transform_2(%arg0: i32) -> (i32, i32) {
    %c0_i32 = arith.constant 0 : i32
    %c0_i32_0 = arith.constant 0 : i32
    %c0_i32_1 = arith.constant 0 : i32
    return %c0_i32, %c0_i32_0 : i32, i32
  }
  func.func @transform_3(%arg0: i32) -> (i32, i32) {
    %c0_i32 = arith.constant 0 : i32
    %c0_i32_0 = arith.constant 0 : i32
    %c0_i32_1 = arith.constant 0 : i32
    return %c0_i32, %c0_i32_0 : i32, i32
  }
  func.func @transform_4(%arg0: i32) -> (i32, i32, i32) {
    %c0_i32 = arith.constant 0 : i32
    %c0_i32_0 = arith.constant 0 : i32
    %c0_i32_1 = arith.constant 0 : i32
    return %arg0, %c0_i32, %c0_i32_0 : i32, i32, i32
  }
  func.func @transform_5(%arg0: i32) -> (i32, i32, i32) {
    %c0_i32 = arith.constant 0 : i32
    %0 = arith.subi %c0_i32, %arg0 : i32
    %c0_i32_0 = arith.constant 0 : i32
    %c0_i32_1 = arith.constant 0 : i32
    %c0_i32_2 = arith.constant 0 : i32
    return %0, %c0_i32_0, %c0_i32_1 : i32, i32, i32
  }
}

</mosaic_0001>

<bundles_post_ra>
// kernel: tpu_custom_call.1
= control target key start
LH: loop header
LB: loop body
LE: loop exit
PB: predicated region body
PF: predicated region fallthrough
CT: control target
= control target key end

     0   :  { %11 = vsyncpa [#allocation4], 0  ;;  %s2374_s0 = inlined_call_operand.hbm [shape: bf16[8,2,128], index: 0, kind: input, shape index: {}]   ;;  %s2375_s1 = inlined_call_operand.hbm [shape: bf16[8,2,128], index: 1, kind: input, shape index: {}]   ;;  %s2376_s2 = inlined_call_operand.hbm [shape: bf16[32,128], index: 2, kind: input, shape index: {}]   ;;  %s2377_s3 = inlined_call_operand.hbm [shape: bf16[32,128], index: 3, kind: input, shape index: {}]   ;;  %s2378_s4 = inlined_call_operand.hbm [shape: f32[8,2,32], index: 4, kind: output, shape index: {0}]   ;;  %s2379_s5 = inlined_call_operand.hbm [shape: f32[8,2,32], index: 5, kind: output, shape index: {1}]  }
   0x1   :  { %12 = vsyncpa [#allocation7], 0 }
   0x2   :  { %13 = vsyncpa [#allocation10], 0 }
   0x3   :  { %14 = vsyncpa [#allocation5], 0 }
   0x4   :  { %15 = vsyncpa [#allocation13], 0  ;;  %s1957_s18 = smov [#allocation6]   ;;  %s1958_s20 = smov [#allocation3]  }
   0x5   :  { %s37_s19 = sshll.u32 %s1957_s18, 4  ;;  %s21_s21 = sshll.u32 %s1958_s20, 4  ;;  %s38_s19 = int_to_ptr.vmem [resolvable:$true] %s37_s19  ;;  %s22_s21 = int_to_ptr.vmem [resolvable:$true] %s21_s21 }
   0x6   :  { %s1835_s22 = scalar_lea.vmem %s38_s19, 128  ;;  %p1840_p1 = scmp.lt.s32.totalorder %s38_s19, %s38_s19 }
   0x7   :  { %p1836_p0 = scmp.ne.s32.totalorder %s38_s19, %s1835_s22  ;;  %p1841_p2 = scmp.lt.s32.totalorder %s1835_s22, %s1835_s22 }
   0x9   :  { %p1842_p3 = por %p1841_p2, %p1840_p1 }
   0xb   :  { %p1843_p4 = pnand %p1842_p3, %p1836_p0 }
   0xd   :  { %1846 = shalt.err (!%p1843_p4)
}
   0xe   :  { %s1959_s23 = smov 16   ;;  %s1960_s24 = smov 1  }
   0xf   :  { %43 = dma.hbm_to_vmem [thread:$0]  %s2375_s1, 128, %s38_s19, [#allocation7], %s1959_s23, %s1959_s23, %s1960_s24  }
  0x10   :  { %s1855_s27 = scalar_lea.vmem %s22_s21, 128  ;;  %p1860_p6 = scmp.lt.s32.totalorder %s22_s21, %s22_s21 }
  0x11   :  { %p1856_p5 = scmp.ne.s32.totalorder %s22_s21, %s1855_s27  ;;  %p1861_p7 = scmp.lt.s32.totalorder %s1855_s27, %s1855_s27 }
  0x13   :  { %p1862_p8 = por %p1861_p7, %p1860_p6 }
  0x15   :  { %p1863_p9 = pnand %p1862_p8, %p1856_p5 }
  0x17   :  { %1866 = shalt.err (!%p1863_p9)
}
  0x18   :  { %27 = dma.hbm_to_vmem [thread:$0]  %s2374_s0, 128, %s22_s21, [#allocation4], %s1959_s23, %s1959_s23, %s1960_s24  }
  0x19   :  { %s1961_s30 = smov [#allocation8]  }
  0x1a   :  { %s49_s6 = sshll.u32 %s1961_s30, 4  ;;  %s50_s6 = int_to_ptr.vmem [resolvable:$true] %s49_s6 }
  0x1b   :  { %s1875_s7 = scalar_lea.vmem %s50_s6, 256  ;;  %p1880_p11 = scmp.lt.s32.totalorder %s50_s6, %s50_s6 }
  0x1c   :  { %p1876_p10 = scmp.ne.s32.totalorder %s50_s6, %s1875_s7  ;;  %p1881_p12 = scmp.lt.s32.totalorder %s1875_s7, %s1875_s7 }
  0x1e   :  { %p1882_p13 = por %p1881_p12, %p1880_p11 }
  0x20   :  { %p1883_p0 = pnand %p1882_p13, %p1876_p10 }
  0x22   :  { %1886 = shalt.err (!%p1883_p0)
}
  0x23   :  { %s1962_s1 = smov 64   ;;  %s1963_s8 = smov 4  }
  0x24   :  { %55 = dma.hbm_to_vmem [thread:$0]  %s2376_s2, 256, %s50_s6, [#allocation7], %s1962_s1, %s1962_s1, %s1963_s8  }
  0x25   :  { %s1964_s11 = smov [#allocation9]  }
  0x26   :  { %s61_s0 = sshll.u32 %s1964_s11, 4  ;;  %s62_s0 = int_to_ptr.vmem [resolvable:$true] %s61_s0 }
  0x27   :  { %s1895_s12 = scalar_lea.vmem %s62_s0, 256  ;;  %p1900_p2 = scmp.lt.s32.totalorder %s62_s0, %s62_s0 }
  0x28   :  { %p1896_p1 = scmp.ne.s32.totalorder %s62_s0, %s1895_s12  ;;  %p1901_p3 = scmp.lt.s32.totalorder %s1895_s12, %s1895_s12 }
  0x2a   :  { %p1902_p4 = por %p1901_p3, %p1900_p2 }
  0x2c   :  { %p1903_p5 = pnand %p1902_p4, %p1896_p1 }
  0x2e   :  { %1906 = shalt.err (!%p1903_p5)
}
  0x2f   :  { %67 = dma.hbm_to_vmem [thread:$0]  %s2377_s3, 256, %s62_s0, [#allocation10], %s1962_s1, %s1962_s1, %s1963_s8  }
  0x30   :  { %1947 = dma.done.wait [#allocation4], 128  }
  0x31   :  { %1948 = vsyncadd [#allocation4], 4294967168 }
  0x32   :  { %1949 = dma.done.wait [#allocation7], 384  }
  0x33   :  { %1950 = vsyncadd [#allocation7], 4294966912 }
  0x34   :  { %1951 = dma.done.wait [#allocation10], 256  }
  0x35   :  { %1952 = vsyncadd [#allocation10], 4294967040  ;;  %vm89_vm0 = vcmask 254976   ;;  %v1965_v0 = vmov 0.0   ;;  %vm1966_vm1 = vmmov 0   ;;  %v2032_v1 = vld [vmem:[#allocation8 + $0x8] sm:$0xff]  }
  0x36   :  { %1552 = vmatprep.subr.bf16.mxu0 %v1965_v0  ;;  %1560 = vmatprep.subr.bf16.mxu1 %v1965_v0  ;;  %90 = vst.msk [vmem:[#allocation2] sm:$0x3] %vm89_vm0, %v1965_v0  ;;  %91 = vst.msk [vmem:[#allocation2 + $0x2] sm:$0x3] %vm89_vm0, %v1965_v0  ;;  %v2034_v2 = vld [vmem:[#allocation9 + $0x8] sm:$0xff]   ;;  %v2037_v3 = vld [vmem:[#allocation8] sm:$0xff]  }
  0x37   :  { %92 = vst.msk [vmem:[#allocation2 + $0x4] sm:$0x3] %vm89_vm0, %v1965_v0  ;;  %93 = vst.msk [vmem:[#allocation2 + $0x6] sm:$0x3] %vm89_vm0, %v1965_v0  ;;  %1556 = vmatprep.mubr.msk.bf16.mxu0 %vm1966_vm1, %v1965_v0  ;;  %1564 = vmatprep.mubr.msk.bf16.mxu1 %vm1966_vm1, %v1965_v0  ;;  %v2041_v4 = vld [vmem:[#allocation9] sm:$0xff]   ;;  %s1967_s2 = smov 32  }
  0x38   :  { %1553 = vmatpush3.bf16.msra.mxu0 %v2032_v1  ;;  %1561 = vmatpush3.bf16.msra.mxu1 %v2034_v2  ;;  %vm124_vm2 = vcmask 261120   ;;  %v110_v11 = vld [vmem:[#allocation3] sm:$0x1]  ;;  %v170_v12 = vld [vmem:[#allocation6 + $0x7] sm:$0x1]  ;;  %s1968_s3 = smov 96  }
  0x39   :  { %1554 = vmatprep.subr.bf16.mxu0 %v1965_v0  ;;  %1562 = vmatprep.subr.bf16.mxu1 %v1965_v0  ;;  %v111_v13 = vunpack.c.l.bf16 %v110_v11  ;;  %v171_v14 = vunpack.c.l.bf16 %v170_v12  ;;  %v297_v57 = vld [vmem:[#allocation3 + $0x1] sm:$0x1]  ;;  %v347_v59 = vld [vmem:[#allocation6 + $0x6] sm:$0x1]  ;;  %s1969_s15 = smov [#allocation11]   ;;  %s1970_s17 = smov [#allocation12]  }
  0x3a   :  { %v298_v58 = vunpack.c.l.bf16 %v297_v57  ;;  %v348_v62 = vunpack.c.l.bf16 %v347_v59  ;;  %s1430_s16 = sshll.u32 %s1969_s15, 4  ;;  %s1446_s18 = sshll.u32 %s1970_s17, 4  ;;  %s1431_s16 = int_to_ptr.vmem [resolvable:$true] %s1430_s16  ;;  %s1447_s18 = int_to_ptr.vmem [resolvable:$true] %s1446_s18 }
  0x3b   :  { %s1907_s19 = scalar_lea.vmem %s1431_s16, 256  ;;  %p1912_p7 = scmp.lt.s32.totalorder %s1431_s16, %s1431_s16 }
  0x3c   :  { %1555 = vmatpush3.bf16.msra.mxu0 %v2037_v3  ;;  %1563 = vmatpush3.bf16.msra.mxu1 %v2041_v4  ;;  %p1908_p6 = scmp.ne.s32.totalorder %s1431_s16, %s1907_s19  ;;  %p1913_p8 = scmp.lt.s32.totalorder %s1907_s19, %s1907_s19 }
  0x3d   :  { %v102_v5 = vld [vmem:[#allocation2] sm:$0x3]  ;;  %v104_v6 = vld [vmem:[#allocation2 + $0x2] sm:$0x3]  ;;  %1568 = vmatprep.subr.bf16.mxu0 %v1965_v0  ;;  %1576 = vmatprep.subr.bf16.mxu1 %v1965_v0 }
  0x3e   :  { %v106_v7 = vld [vmem:[#allocation2 + $0x4] sm:$0x3]  ;;  %v109_v8 = vpack.c.bf16 %v102_v5, %v102_v5  ;;  %v168_v9 = vpack.c.bf16 %v104_v6, %v104_v6  ;;  %v108_v10 = vld [vmem:[#allocation2 + $0x6] sm:$0x3]  ;;  %p1914_p9 = por %p1913_p8, %p1912_p7 }
  0x3f   :  { %235 = vrot.lane.b32.xlu1 %v106_v7, %s1967_s2 }
  0x40   :  { %1557 = vmatmul.mubr.msk.bf16.vlgmr.msra.gmra.mxu0 %vm124_vm2, %v109_v8  ;;  %1565 = vmatmul.mubr.msk.bf16.vlgmr.msra.gmra.mxu1 %vm124_vm2, %v168_v9  ;;  %p1915_p10 = pnand %p1914_p9, %p1908_p6 }
  0x41   :  { %1569 = vmatpush3.bf16.msra.mxu0 %v2032_v1  ;;  %1577 = vmatpush3.bf16.msra.mxu1 %v2034_v2 }
  0x42   :  { %1570 = vmatprep.subr.bf16.mxu0 %v1965_v0  ;;  %1572 = vmatprep.mubr.msk.bf16.mxu0 %vm1966_vm1, %v1965_v0 }
  0x43   :  { %263 = vrot.lane.b32.xlu1 %v108_v10, %s1967_s2  ;;  %1578 = vmatprep.subr.bf16.mxu1 %v1965_v0 }
  0x44   :  { %1580 = vmatprep.mubr.msk.bf16.mxu1 %vm1966_vm1, %v1965_v0 }
  0x45   :  { %1571 = vmatpush3.bf16.msra.mxu0 %v2037_v3  ;;  %1579 = vmatpush3.bf16.msra.mxu1 %v2041_v4 }
  0x46   :  { %1584 = vmatprep.subr.bf16.mxu0 %v1965_v0  ;;  %1592 = vmatprep.subr.bf16.mxu1 %v1965_v0 }
  0xb1   :  { %v236_v39 = vpop.permute.xlu1 %235 }
  0xb5   :  { %v264_v41 = vpop.permute.xlu1 %263 }
 0x100   :  { %v162_v15 = vpop.f32.mrf.mxu0  ;;  %v221_v17 = vpop.f32.mrf.mxu1 }
 0x101   :  { %v163_v16 = vadd.f32 %v162_v15, %v111_v13  ;;  %v222_v18 = vadd.f32 %v221_v17, %v171_v14 }
 0x102   :  { %v1558_v19 = vpop.f32.mrf.mxu0  ;;  %v1566_v20 = vpop.f32.mrf.mxu1 }
 0x103   :  { %1699 = vtanh.f32 %v163_v16  ;;  %v1474_v27 = vmul.f32 -1.442695, %v163_v16  ;;  %v1475_v28 = vmul.f32 -1.442695, %v222_v18 }
 0x104   :  { %v165_v21 = vpop.f32.mrf.mxu0  ;;  %1701 = vtanh.f32 %v222_v18  ;;  %v224_v22 = vpop.f32.mrf.mxu1 }
 0x105   :  { %1703 = vpow2.f32 %v1474_v27 }
 0x106   :  { %v1559_v23 = vpop.f32.mrf.mxu0  ;;  %v1567_v24 = vpop.f32.mrf.mxu1  ;;  %1705 = vpow2.f32 %v1475_v28 }
 0x110   :  { %v1700_v25 = vpop.eup %1699 }
 0x111   :  { %240 = vrot.lane.b32.xlu0 %v1700_v25, %s1962_s1  ;;  %v1702_v26 = vpop.eup %1701 }
 0x112   :  { %v1704_v29 = vpop.eup %1703 }
 0x113   :  { %v230_v30 = vadd.f32 1.0, %v1704_v29  ;;  %v1706_v31 = vpop.eup %1705 }
 0x114   :  { %v258_v32 = vadd.f32 1.0, %v1706_v31 }
 0x115   :  { %268 = vrot.lane.b32.xlu0 %v1702_v26, %s1962_s1  ;;  %1707 = vrcp.f32 %v230_v30 }
 0x116   :  { %1709 = vrcp.f32 %v258_v32 }
 0x122   :  { %v1708_v33 = vpop.eup %1707 }
 0x123   :  { %v1710_v36 = vpop.eup %1709  ;;  %v238_v40 = vmul.f32 %v1708_v33, %v236_v39 }
 0x124   :  { %v266_v44 = vmul.f32 %v1710_v36, %v264_v41 }
 0x183   :  { %v241_v34 = vpop.permute.xlu0 %240 }
 0x184   :  { %v243_v35 = vmul.f32 %v1708_v33, %v241_v34 }
 0x186   :  { %245 = vrot.lane.b32.xlu0 %v243_v35, %s1967_s2 }
 0x187   :  { %v269_v37 = vpop.permute.xlu0 %268 }
 0x188   :  { %v271_v38 = vmul.f32 %v1710_v36, %v269_v37 }
 0x18a   :  { %273 = vrot.lane.b32.xlu1 %v271_v38, %s1967_s2 }
 0x1f8   :  { %v246_v42 = vpop.permute.xlu0 %245 }
 0x1f9   :  { %v2068_v43 = vadd.f32 %v246_v42, %v238_v40  ;;  %v457_v42 = vld [vmem:[#allocation3 + $0x2] sm:$0x1] }
 0x1fb   :  { %1711 = vtanh.f32 %v2068_v43 }
 0x1fc   :  { %v274_v45 = vpop.permute.xlu1 %273 }
 0x1fd   :  { %v2071_v46 = vadd.f32 %v274_v45, %v266_v44  ;;  %v507_v44 = vld [vmem:[#allocation6 + $0x5] sm:$0x1] }
 0x1ff   :  { %1713 = vtanh.f32 %v2071_v46 }
 0x208   :  { %v1712_v47 = vpop.eup %1711 }
 0x209   :  { %251 = vrot.lane.b32.xlu0 %v1712_v47, %s1962_s1  ;;  %v508_v47 = vunpack.c.l.bf16 %v507_v44 }
 0x20c   :  { %v1714_v48 = vpop.eup %1713 }
 0x20d   :  { %279 = vrot.lane.b32.xlu1 %v1714_v48, %s1962_s1 }
 0x27b   :  { %v252_v49 = vpop.permute.xlu0 %251 }
 0x27c   :  { %v2076_v50 = vmul.f32 %v1708_v33, %v252_v49 }
 0x27e   :  { %v295_v51 = vpack.c.bf16 %v2076_v50, %v2076_v50 }
 0x27f   :  { %v280_v52 = vpop.permute.xlu1 %279 }
 0x280   :  { %v2080_v53 = vmul.f32 %v1710_v36, %v280_v52  ;;  %300 = vrot.lane.b32.xlu0 %v295_v51, %s1967_s2 }
 0x282   :  { %v345_v54 = vpack.c.bf16 %v2080_v53, %v2080_v53 }
 0x284   :  { %350 = vrot.lane.b32.xlu1 %v345_v54, %s1967_s2 }
 0x2f2   :  { %v301_v55 = vpop.permute.xlu0 %300 }
 0x2f3   :  { %1573 = vmatmul.mubr.msk.bf16.vlgmr.msra.gmra.mxu0 %vm124_vm2, %v301_v55 }
 0x2f4   :  { %1585 = vmatpush3.bf16.msra.mxu0 %v2032_v1  ;;  %1588 = vmatprep.mubr.msk.bf16.mxu0 %vm1966_vm1, %v1965_v0 }
 0x2f5   :  { %1586 = vmatprep.subr.bf16.mxu0 %v1965_v0 }
 0x2f6   :  { %v351_v56 = vpop.permute.xlu1 %350 }
 0x2f7   :  { %1581 = vmatmul.mubr.msk.bf16.vlgmr.msra.gmra.mxu1 %vm124_vm2, %v351_v56 }
 0x2f8   :  { %1593 = vmatpush3.bf16.msra.mxu1 %v2034_v2  ;;  %1587 = vmatpush3.bf16.msra.mxu0 %v2037_v3 }
 0x2f9   :  { %1594 = vmatprep.subr.bf16.mxu1 %v1965_v0  ;;  %1596 = vmatprep.mubr.msk.bf16.mxu1 %vm1966_vm1, %v1965_v0 }
 0x2fa   :  { %1600 = vmatprep.subr.bf16.mxu0 %v1965_v0 }
 0x2fc   :  { %1595 = vmatpush3.bf16.msra.mxu1 %v2041_v4 }
 0x2fd   :  { %1608 = vmatprep.subr.bf16.mxu1 %v1965_v0 }
 0x3b3   :  { %v339_v60 = vpop.f32.mrf.mxu0 }
 0x3b4   :  { %v340_v61 = vadd.f32 %v339_v60, %v298_v58 }
 0x3b5   :  { %v1574_v63 = vpop.f32.mrf.mxu0 }
 0x3b6   :  { %1715 = vtanh.f32 %v340_v61  ;;  %v1478_v14 = vmul.f32 -1.442695, %v340_v61 }
 0x3b7   :  { %v342_v5 = vpop.f32.mrf.mxu0  ;;  %v389_v6 = vpop.f32.mrf.mxu1 }
 0x3b8   :  { %v390_v7 = vadd.f32 %v389_v6, %v348_v62 }
 0x3b9   :  { %v1575_v8 = vpop.f32.mrf.mxu0  ;;  %v1582_v9 = vpop.f32.mrf.mxu1 }
 0x3ba   :  { %1717 = vtanh.f32 %v390_v7  ;;  %v1479_v15 = vmul.f32 -1.442695, %v390_v7 }
 0x3bb   :  { %v392_v10 = vpop.f32.mrf.mxu1  ;;  %1719 = vpow2.f32 %v1478_v14 }
 0x3bc   :  { %1721 = vpow2.f32 %v1479_v15 }
 0x3bd   :  { %v1583_v11 = vpop.f32.mrf.mxu1 }
 0x3c3   :  { %v1716_v12 = vpop.eup %1715 }
 0x3c4   :  { %404 = vrot.lane.b32.xlu0 %v1716_v12, %s1962_s1 }
 0x3c7   :  { %v1718_v13 = vpop.eup %1717 }
 0x3c8   :  { %428 = vrot.lane.b32.xlu1 %v1718_v13, %s1962_s1  ;;  %v1720_v16 = vpop.eup %1719 }
 0x3c9   :  { %v398_v17 = vadd.f32 1.0, %v1720_v16  ;;  %v1722_v18 = vpop.eup %1721 }
 0x3ca   :  { %v422_v19 = vadd.f32 1.0, %v1722_v18 }
 0x3cb   :  { %1723 = vrcp.f32 %v398_v17 }
 0x3cc   :  { %1725 = vrcp.f32 %v422_v19 }
 0x3d8   :  { %v1724_v20 = vpop.eup %1723 }
 0x3d9   :  { %v1726_v23 = vpop.eup %1725  ;;  %v402_v26 = vmul.f32 %v1724_v20, %v2068_v43  ;;  %v458_v43 = vunpack.c.l.bf16 %v457_v42 }
 0x3da   :  { %v426_v29 = vmul.f32 %v1726_v23, %v2071_v46 }
 0x436   :  { %v405_v21 = vpop.permute.xlu0 %404 }
 0x437   :  { %v407_v22 = vmul.f32 %v1724_v20, %v405_v21 }
 0x439   :  { %409 = vrot.lane.b32.xlu0 %v407_v22, %s1967_s2 }
 0x43a   :  { %v429_v24 = vpop.permute.xlu1 %428 }
 0x43b   :  { %v431_v25 = vmul.f32 %v1726_v23, %v429_v24 }
 0x43d   :  { %433 = vrot.lane.b32.xlu1 %v431_v25, %s1967_s2 }
 0x4ab   :  { %v410_v27 = vpop.permute.xlu0 %409 }
 0x4ac   :  { %v2105_v28 = vadd.f32 %v410_v27, %v402_v26 }
 0x4ae   :  { %1727 = vtanh.f32 %v2105_v28 }
 0x4af   :  { %v434_v30 = vpop.permute.xlu1 %433 }
 0x4b0   :  { %v2109_v31 = vadd.f32 %v434_v30, %v426_v29  ;;  %v617_v29 = vld [vmem:[#allocation3 + $0x3] sm:$0x1] }
 0x4b1   :  { %v618_v30 = vunpack.c.l.bf16 %v617_v29 }
 0x4b2   :  { %1729 = vtanh.f32 %v2109_v31 }
 0x4bb   :  { %v1728_v32 = vpop.eup %1727 }
 0x4bc   :  { %415 = vrot.lane.b32.xlu0 %v1728_v32, %s1962_s1 }
 0x4bf   :  { %v1730_v33 = vpop.eup %1729 }
 0x4c0   :  { %439 = vrot.lane.b32.xlu1 %v1730_v33, %s1962_s1 }
 0x52e   :  { %v416_v34 = vpop.permute.xlu0 %415 }
 0x52f   :  { %v2114_v35 = vmul.f32 %v1724_v20, %v416_v34 }
 0x531   :  { %v455_v36 = vpack.c.bf16 %v2114_v35, %v2114_v35 }
 0x532   :  { %v440_v37 = vpop.permute.xlu1 %439 }
 0x533   :  { %v2118_v38 = vmul.f32 %v1726_v23, %v440_v37  ;;  %460 = vrot.lane.b32.xlu0 %v455_v36, %s1967_s2 }
 0x535   :  { %v505_v39 = vpack.c.bf16 %v2118_v38, %v2118_v38 }
 0x537   :  { %510 = vrot.lane.b32.xlu1 %v505_v39, %s1967_s2 }
 0x5a5   :  { %v461_v40 = vpop.permute.xlu0 %460 }
 0x5a6   :  { %1589 = vmatmul.mubr.msk.bf16.vlgmr.msra.gmra.mxu0 %vm124_vm2, %v461_v40 }
 0x5a7   :  { %1601 = vmatpush3.bf16.msra.mxu0 %v2032_v1  ;;  %1604 = vmatprep.mubr.msk.bf16.mxu0 %vm1966_vm1, %v1965_v0 }
 0x5a8   :  { %1602 = vmatprep.subr.bf16.mxu0 %v1965_v0 }
 0x5a9   :  { %v511_v41 = vpop.permute.xlu1 %510 }
 0x5aa   :  { %1597 = vmatmul.mubr.msk.bf16.vlgmr.msra.gmra.mxu1 %vm124_vm2, %v511_v41 }
 0x5ab   :  { %1609 = vmatpush3.bf16.msra.mxu1 %v2034_v2  ;;  %1603 = vmatpush3.bf16.msra.mxu0 %v2037_v3 }
 0x5ac   :  { %1610 = vmatprep.subr.bf16.mxu1 %v1965_v0  ;;  %1612 = vmatprep.mubr.msk.bf16.mxu1 %vm1966_vm1, %v1965_v0 }
 0x5ad   :  { %1616 = vmatprep.subr.bf16.mxu0 %v1965_v0 }
 0x5af   :  { %1611 = vmatpush3.bf16.msra.mxu1 %v2041_v4 }
 0x5b0   :  { %1624 = vmatprep.subr.bf16.mxu1 %v1965_v0 }
 0x666   :  { %v499_v45 = vpop.f32.mrf.mxu0 }
 0x667   :  { %v500_v46 = vadd.f32 %v499_v45, %v458_v43 }
 0x668   :  { %v1590_v48 = vpop.f32.mrf.mxu0 }
 0x669   :  { %1731 = vtanh.f32 %v500_v46  ;;  %v1482_v60 = vmul.f32 -1.442695, %v500_v46 }
 0x66a   :  { %v502_v49 = vpop.f32.mrf.mxu0  ;;  %v549_v51 = vpop.f32.mrf.mxu1 }
 0x66b   :  { %v550_v52 = vadd.f32 %v549_v51, %v508_v47 }
 0x66c   :  { %v1591_v54 = vpop.f32.mrf.mxu0  ;;  %v1598_v55 = vpop.f32.mrf.mxu1 }
 0x66d   :  { %1733 = vtanh.f32 %v550_v52  ;;  %v1483_v61 = vmul.f32 -1.442695, %v550_v52 }
 0x66e   :  { %v552_v56 = vpop.f32.mrf.mxu1  ;;  %1735 = vpow2.f32 %v1482_v60 }
 0x66f   :  { %1737 = vpow2.f32 %v1483_v61 }
 0x670   :  { %v1599_v57 = vpop.f32.mrf.mxu1 }
 0x676   :  { %v1732_v58 = vpop.eup %1731 }
 0x677   :  { %564 = vrot.lane.b32.xlu0 %v1732_v58, %s1962_s1 }
 0x67a   :  { %v1734_v59 = vpop.eup %1733 }
 0x67b   :  { %588 = vrot.lane.b32.xlu1 %v1734_v59, %s1962_s1  ;;  %v1736_v62 = vpop.eup %1735 }
 0x67c   :  { %v558_v63 = vadd.f32 1.0, %v1736_v62  ;;  %v1738_v5 = vpop.eup %1737 }
 0x67d   :  { %v582_v6 = vadd.f32 1.0, %v1738_v5 }
 0x67e   :  { %1739 = vrcp.f32 %v558_v63 }
 0x67f   :  { %1741 = vrcp.f32 %v582_v6 }
 0x68b   :  { %v1740_v7 = vpop.eup %1739 }
 0x68c   :  { %v1742_v10 = vpop.eup %1741  ;;  %v562_v13 = vmul.f32 %v1740_v7, %v2105_v28 }
 0x68d   :  { %v586_v16 = vmul.f32 %v1742_v10, %v2109_v31  ;;  %v667_v31 = vld [vmem:[#allocation6 + $0x4] sm:$0x1] }
 0x68e   :  { %v668_v34 = vunpack.c.l.bf16 %v667_v31 }
 0x6e9   :  { %v565_v8 = vpop.permute.xlu0 %564 }
 0x6ea   :  { %v567_v9 = vmul.f32 %v1740_v7, %v565_v8 }
 0x6ec   :  { %569 = vrot.lane.b32.xlu0 %v567_v9, %s1967_s2 }
 0x6ed   :  { %v589_v11 = vpop.permute.xlu1 %588 }
 0x6ee   :  { %v591_v12 = vmul.f32 %v1742_v10, %v589_v11 }
 0x6f0   :  { %593 = vrot.lane.b32.xlu1 %v591_v12, %s1967_s2 }
 0x75e   :  { %v570_v14 = vpop.permute.xlu0 %569 }
 0x75f   :  { %v2143_v15 = vadd.f32 %v570_v14, %v562_v13 }
 0x761   :  { %1743 = vtanh.f32 %v2143_v15 }
 0x762   :  { %v594_v17 = vpop.permute.xlu1 %593 }
 0x763   :  { %v2147_v18 = vadd.f32 %v594_v17, %v586_v16 }
 0x765   :  { %1745 = vtanh.f32 %v2147_v18 }
 0x76e   :  { %v1744_v19 = vpop.eup %1743 }
 0x76f   :  { %575 = vrot.lane.b32.xlu0 %v1744_v19, %s1962_s1 }
 0x772   :  { %v1746_v20 = vpop.eup %1745 }
 0x773   :  { %599 = vrot.lane.b32.xlu1 %v1746_v20, %s1962_s1  ;;  %v827_v20 = vld [vmem:[#allocation6 + $0x3] sm:$0x1] }
 0x7e1   :  { %v576_v21 = vpop.permute.xlu0 %575 }
 0x7e2   :  { %v2152_v22 = vmul.f32 %v1740_v7, %v576_v21 }
 0x7e4   :  { %v615_v23 = vpack.c.bf16 %v2152_v22, %v2152_v22 }
 0x7e5   :  { %v600_v24 = vpop.permute.xlu1 %599 }
 0x7e6   :  { %v2156_v25 = vmul.f32 %v1742_v10, %v600_v24  ;;  %620 = vrot.lane.b32.xlu0 %v615_v23, %s1967_s2  ;;  %v828_v24 = vunpack.c.l.bf16 %v827_v20 }
 0x7e8   :  { %v665_v26 = vpack.c.bf16 %v2156_v25, %v2156_v25 }
 0x7ea   :  { %670 = vrot.lane.b32.xlu1 %v665_v26, %s1967_s2 }
 0x858   :  { %v621_v27 = vpop.permute.xlu0 %620 }
 0x859   :  { %1605 = vmatmul.mubr.msk.bf16.vlgmr.msra.gmra.mxu0 %vm124_vm2, %v621_v27 }
 0x85a   :  { %1617 = vmatpush3.bf16.msra.mxu0 %v2032_v1  ;;  %1620 = vmatprep.mubr.msk.bf16.mxu0 %vm1966_vm1, %v1965_v0 }
 0x85b   :  { %1618 = vmatprep.subr.bf16.mxu0 %v1965_v0 }
 0x85c   :  { %v671_v28 = vpop.permute.xlu1 %670 }
 0x85d   :  { %1613 = vmatmul.mubr.msk.bf16.vlgmr.msra.gmra.mxu1 %vm124_vm2, %v671_v28 }
 0x85e   :  { %1625 = vmatpush3.bf16.msra.mxu1 %v2034_v2  ;;  %1619 = vmatpush3.bf16.msra.mxu0 %v2037_v3 }
 0x85f   :  { %1626 = vmatprep.subr.bf16.mxu1 %v1965_v0  ;;  %1628 = vmatprep.mubr.msk.bf16.mxu1 %vm1966_vm1, %v1965_v0 }
 0x860   :  { %1632 = vmatprep.subr.bf16.mxu0 %v1965_v0 }
 0x862   :  { %1627 = vmatpush3.bf16.msra.mxu1 %v2041_v4 }
 0x863   :  { %1640 = vmatprep.subr.bf16.mxu1 %v1965_v0 }
 0x919   :  { %v659_v32 = vpop.f32.mrf.mxu0 }
 0x91a   :  { %v660_v33 = vadd.f32 %v659_v32, %v618_v30 }
 0x91b   :  { %v1606_v36 = vpop.f32.mrf.mxu0 }
 0x91c   :  { %1747 = vtanh.f32 %v660_v33  ;;  %v1486_v47 = vmul.f32 -1.442695, %v660_v33 }
 0x91d   :  { %v662_v37 = vpop.f32.mrf.mxu0  ;;  %v709_v39 = vpop.f32.mrf.mxu1 }
 0x91e   :  { %v710_v40 = vadd.f32 %v709_v39, %v668_v34 }
 0x91f   :  { %v1607_v41 = vpop.f32.mrf.mxu0  ;;  %v1614_v42 = vpop.f32.mrf.mxu1 }
 0x920   :  { %1749 = vtanh.f32 %v710_v40  ;;  %v1487_v48 = vmul.f32 -1.442695, %v710_v40 }
 0x921   :  { %v712_v43 = vpop.f32.mrf.mxu1  ;;  %1751 = vpow2.f32 %v1486_v47 }
 0x922   :  { %1753 = vpow2.f32 %v1487_v48 }
 0x923   :  { %v1615_v44 = vpop.f32.mrf.mxu1 }
 0x929   :  { %v1748_v45 = vpop.eup %1747 }
 0x92a   :  { %724 = vrot.lane.b32.xlu0 %v1748_v45, %s1962_s1 }
 0x92d   :  { %v1750_v46 = vpop.eup %1749 }
 0x92e   :  { %748 = vrot.lane.b32.xlu1 %v1750_v46, %s1962_s1  ;;  %v1752_v49 = vpop.eup %1751 }
 0x92f   :  { %v718_v51 = vadd.f32 1.0, %v1752_v49  ;;  %v1754_v52 = vpop.eup %1753 }
 0x930   :  { %v742_v54 = vadd.f32 1.0, %v1754_v52 }
 0x931   :  { %1755 = vrcp.f32 %v718_v51 }
 0x932   :  { %1757 = vrcp.f32 %v742_v54 }
 0x93e   :  { %v1756_v55 = vpop.eup %1755 }
 0x93f   :  { %v1758_v58 = vpop.eup %1757  ;;  %v722_v61 = vmul.f32 %v1756_v55, %v2143_v15 }
 0x940   :  { %v746_v5 = vmul.f32 %v1758_v58, %v2147_v18  ;;  %v777_v18 = vld [vmem:[#allocation3 + $0x4] sm:$0x1] }
 0x941   :  { %v778_v19 = vunpack.c.l.bf16 %v777_v18 }
 0x99c   :  { %v725_v56 = vpop.permute.xlu0 %724 }
 0x99d   :  { %v727_v57 = vmul.f32 %v1756_v55, %v725_v56 }
 0x99f   :  { %729 = vrot.lane.b32.xlu0 %v727_v57, %s1967_s2 }
 0x9a0   :  { %v749_v59 = vpop.permute.xlu1 %748 }
 0x9a1   :  { %v751_v60 = vmul.f32 %v1758_v58, %v749_v59 }
 0x9a3   :  { %753 = vrot.lane.b32.xlu1 %v751_v60, %s1967_s2 }
 0xa11   :  { %v730_v62 = vpop.permute.xlu0 %729 }
 0xa12   :  { %v2181_v63 = vadd.f32 %v730_v62, %v722_v61 }
 0xa14   :  { %1759 = vtanh.f32 %v2181_v63 }
 0xa15   :  { %v754_v6 = vpop.permute.xlu1 %753 }
 0xa16   :  { %v2185_v7 = vadd.f32 %v754_v6, %v746_v5 }
 0xa18   :  { %1761 = vtanh.f32 %v2185_v7 }
 0xa21   :  { %v1760_v8 = vpop.eup %1759 }
 0xa22   :  { %735 = vrot.lane.b32.xlu0 %v1760_v8, %s1962_s1 }
 0xa25   :  { %v1762_v9 = vpop.eup %1761 }
 0xa26   :  { %759 = vrot.lane.b32.xlu1 %v1762_v9, %s1962_s1  ;;  %v937_v9 = vld [vmem:[#allocation3 + $0x5] sm:$0x1] }
 0xa94   :  { %v736_v10 = vpop.permute.xlu0 %735 }
 0xa95   :  { %v2190_v11 = vmul.f32 %v1756_v55, %v736_v10  ;;  %v938_v10 = vunpack.c.l.bf16 %v937_v9 }
 0xa97   :  { %v775_v12 = vpack.c.bf16 %v2190_v11, %v2190_v11 }
 0xa98   :  { %v760_v13 = vpop.permute.xlu1 %759 }
 0xa99   :  { %v2194_v14 = vmul.f32 %v1758_v58, %v760_v13  ;;  %780 = vrot.lane.b32.xlu0 %v775_v12, %s1967_s2  ;;  %v987_v12 = vld [vmem:[#allocation6 + $0x2] sm:$0x1] }
 0xa9b   :  { %v825_v15 = vpack.c.bf16 %v2194_v14, %v2194_v14 }
 0xa9d   :  { %830 = vrot.lane.b32.xlu1 %v825_v15, %s1967_s2 }
 0xb0b   :  { %v781_v16 = vpop.permute.xlu0 %780 }
 0xb0c   :  { %1621 = vmatmul.mubr.msk.bf16.vlgmr.msra.gmra.mxu0 %vm124_vm2, %v781_v16  ;;  %v988_v16 = vunpack.c.l.bf16 %v987_v12 }
 0xb0d   :  { %1633 = vmatpush3.bf16.msra.mxu0 %v2032_v1  ;;  %1636 = vmatprep.mubr.msk.bf16.mxu0 %vm1966_vm1, %v1965_v0 }
 0xb0e   :  { %1634 = vmatprep.subr.bf16.mxu0 %v1965_v0 }
 0xb0f   :  { %v831_v17 = vpop.permute.xlu1 %830 }
 0xb10   :  { %1629 = vmatmul.mubr.msk.bf16.vlgmr.msra.gmra.mxu1 %vm124_vm2, %v831_v17 }
 0xb11   :  { %1641 = vmatpush3.bf16.msra.mxu1 %v2034_v2  ;;  %1635 = vmatpush3.bf16.msra.mxu0 %v2037_v3 }
 0xb12   :  { %1642 = vmatprep.subr.bf16.mxu1 %v1965_v0  ;;  %1644 = vmatprep.mubr.msk.bf16.mxu1 %vm1966_vm1, %v1965_v0 }
 0xb13   :  { %1648 = vmatprep.subr.bf16.mxu0 %v1965_v0 }
 0xb15   :  { %1643 = vmatpush3.bf16.msra.mxu1 %v2041_v4 }
 0xb16   :  { %1656 = vmatprep.subr.bf16.mxu1 %v1965_v0 }
 0xbcc   :  { %v819_v21 = vpop.f32.mrf.mxu0 }
 0xbcd   :  { %v820_v23 = vadd.f32 %v819_v21, %v778_v19 }
 0xbce   :  { %v1622_v26 = vpop.f32.mrf.mxu0 }
 0xbcf   :  { %1763 = vtanh.f32 %v820_v23  ;;  %v1490_v37 = vmul.f32 -1.442695, %v820_v23 }
 0xbd0   :  { %v822_v27 = vpop.f32.mrf.mxu0  ;;  %v869_v28 = vpop.f32.mrf.mxu1 }
 0xbd1   :  { %v870_v29 = vadd.f32 %v869_v28, %v828_v24 }
 0xbd2   :  { %v1623_v30 = vpop.f32.mrf.mxu0  ;;  %v1630_v31 = vpop.f32.mrf.mxu1 }
 0xbd3   :  { %1765 = vtanh.f32 %v870_v29  ;;  %v1491_v39 = vmul.f32 -1.442695, %v870_v29 }
 0xbd4   :  { %v872_v32 = vpop.f32.mrf.mxu1  ;;  %1767 = vpow2.f32 %v1490_v37 }
 0xbd5   :  { %1769 = vpow2.f32 %v1491_v39 }
 0xbd6   :  { %v1631_v33 = vpop.f32.mrf.mxu1 }
 0xbdc   :  { %v1764_v34 = vpop.eup %1763 }
 0xbdd   :  { %884 = vrot.lane.b32.xlu0 %v1764_v34, %s1962_s1 }
 0xbe0   :  { %v1766_v36 = vpop.eup %1765 }
 0xbe1   :  { %908 = vrot.lane.b32.xlu1 %v1766_v36, %s1962_s1  ;;  %v1768_v40 = vpop.eup %1767 }
 0xbe2   :  { %v878_v41 = vadd.f32 1.0, %v1768_v40  ;;  %v1770_v42 = vpop.eup %1769 }
 0xbe3   :  { %v902_v43 = vadd.f32 1.0, %v1770_v42 }
 0xbe4   :  { %1771 = vrcp.f32 %v878_v41 }
 0xbe5   :  { %1773 = vrcp.f32 %v902_v43 }
 0xbf1   :  { %v1772_v44 = vpop.eup %1771 }
 0xbf2   :  { %v1774_v47 = vpop.eup %1773  ;;  %v882_v51 = vmul.f32 %v1772_v44, %v2181_v63 }
 0xbf3   :  { %v906_v55 = vmul.f32 %v1774_v47, %v2185_v7 }
 0xc4f   :  { %v885_v45 = vpop.permute.xlu0 %884 }
 0xc50   :  { %v887_v46 = vmul.f32 %v1772_v44, %v885_v45 }
 0xc52   :  { %889 = vrot.lane.b32.xlu0 %v887_v46, %s1967_s2 }
 0xc53   :  { %v909_v48 = vpop.permute.xlu1 %908 }
 0xc54   :  { %v911_v49 = vmul.f32 %v1774_v47, %v909_v48 }
 0xc56   :  { %913 = vrot.lane.b32.xlu1 %v911_v49, %s1967_s2 }
 0xcc4   :  { %v890_v52 = vpop.permute.xlu0 %889 }
 0xcc5   :  { %v2219_v54 = vadd.f32 %v890_v52, %v882_v51 }
 0xcc7   :  { %1775 = vtanh.f32 %v2219_v54 }
 0xcc8   :  { %v914_v56 = vpop.permute.xlu1 %913 }
 0xcc9   :  { %v2223_v57 = vadd.f32 %v914_v56, %v906_v55 }
 0xccb   :  { %1777 = vtanh.f32 %v2223_v57 }
 0xcd4   :  { %v1776_v58 = vpop.eup %1775 }
 0xcd5   :  { %895 = vrot.lane.b32.xlu0 %v1776_v58, %s1962_s1 }
 0xcd8   :  { %v1778_v59 = vpop.eup %1777 }
 0xcd9   :  { %919 = vrot.lane.b32.xlu1 %v1778_v59, %s1962_s1 }
 0xd47   :  { %v896_v60 = vpop.permute.xlu0 %895 }
 0xd48   :  { %v2228_v61 = vmul.f32 %v1772_v44, %v896_v60 }
 0xd4a   :  { %v935_v62 = vpack.c.bf16 %v2228_v61, %v2228_v61 }
 0xd4b   :  { %v920_v63 = vpop.permute.xlu1 %919 }
 0xd4c   :  { %v2232_v5 = vmul.f32 %v1774_v47, %v920_v63  ;;  %940 = vrot.lane.b32.xlu0 %v935_v62, %s1967_s2  ;;  %v1147_v63 = vld [vmem:[#allocation6 + $0x1] sm:$0x1] }
 0xd4e   :  { %v985_v6 = vpack.c.bf16 %v2232_v5, %v2232_v5 }
 0xd50   :  { %990 = vrot.lane.b32.xlu1 %v985_v6, %s1967_s2 }
 0xdbe   :  { %v941_v7 = vpop.permute.xlu0 %940 }
 0xdbf   :  { %1637 = vmatmul.mubr.msk.bf16.vlgmr.msra.gmra.mxu0 %vm124_vm2, %v941_v7 }
 0xdc0   :  { %1649 = vmatpush3.bf16.msra.mxu0 %v2032_v1  ;;  %1652 = vmatprep.mubr.msk.bf16.mxu0 %vm1966_vm1, %v1965_v0 }
 0xdc1   :  { %1650 = vmatprep.subr.bf16.mxu0 %v1965_v0 }
 0xdc2   :  { %v991_v8 = vpop.permute.xlu1 %990 }
 0xdc3   :  { %1645 = vmatmul.mubr.msk.bf16.vlgmr.msra.gmra.mxu1 %vm124_vm2, %v991_v8  ;;  %v1148_v8 = vunpack.c.l.bf16 %v1147_v63 }
 0xdc4   :  { %1657 = vmatpush3.bf16.msra.mxu1 %v2034_v2  ;;  %1651 = vmatpush3.bf16.msra.mxu0 %v2037_v3 }
 0xdc5   :  { %1658 = vmatprep.subr.bf16.mxu1 %v1965_v0  ;;  %1660 = vmatprep.mubr.msk.bf16.mxu1 %vm1966_vm1, %v1965_v0 }
 0xdc6   :  { %1664 = vmatprep.subr.bf16.mxu0 %v1965_v0 }
 0xdc8   :  { %1659 = vmatpush3.bf16.msra.mxu1 %v2041_v4 }
 0xdc9   :  { %1672 = vmatprep.subr.bf16.mxu1 %v1965_v0 }
 0xe7f   :  { %v979_v13 = vpop.f32.mrf.mxu0 }
 0xe80   :  { %v980_v15 = vadd.f32 %v979_v13, %v938_v10 }
 0xe81   :  { %v1638_v17 = vpop.f32.mrf.mxu0 }
 0xe82   :  { %1779 = vtanh.f32 %v980_v15  ;;  %v1494_v29 = vmul.f32 -1.442695, %v980_v15 }
 0xe83   :  { %v982_v18 = vpop.f32.mrf.mxu0  ;;  %v1029_v19 = vpop.f32.mrf.mxu1 }
 0xe84   :  { %v1030_v20 = vadd.f32 %v1029_v19, %v988_v16 }
 0xe85   :  { %v1639_v21 = vpop.f32.mrf.mxu0  ;;  %v1646_v23 = vpop.f32.mrf.mxu1 }
 0xe86   :  { %1781 = vtanh.f32 %v1030_v20  ;;  %v1495_v30 = vmul.f32 -1.442695, %v1030_v20 }
 0xe87   :  { %v1032_v24 = vpop.f32.mrf.mxu1  ;;  %1783 = vpow2.f32 %v1494_v29 }
 0xe88   :  { %1785 = vpow2.f32 %v1495_v30 }
 0xe89   :  { %v1647_v26 = vpop.f32.mrf.mxu1 }
 0xe8f   :  { %v1780_v27 = vpop.eup %1779 }
 0xe90   :  { %1044 = vrot.lane.b32.xlu0 %v1780_v27, %s1962_s1 }
 0xe93   :  { %v1782_v28 = vpop.eup %1781 }
 0xe94   :  { %1068 = vrot.lane.b32.xlu1 %v1782_v28, %s1962_s1  ;;  %v1784_v31 = vpop.eup %1783 }
 0xe95   :  { %v1038_v32 = vadd.f32 1.0, %v1784_v31  ;;  %v1786_v33 = vpop.eup %1785 }
 0xe96   :  { %v1062_v34 = vadd.f32 1.0, %v1786_v33 }
 0xe97   :  { %1787 = vrcp.f32 %v1038_v32 }
 0xe98   :  { %1789 = vrcp.f32 %v1062_v34 }
 0xea4   :  { %v1788_v36 = vpop.eup %1787 }
 0xea5   :  { %v1790_v40 = vpop.eup %1789  ;;  %v1042_v43 = vmul.f32 %v1788_v36, %v2219_v54 }
 0xea6   :  { %v1066_v46 = vmul.f32 %v1790_v40, %v2223_v57 }
 0xf02   :  { %v1045_v37 = vpop.permute.xlu0 %1044 }
 0xf03   :  { %v1047_v39 = vmul.f32 %v1788_v36, %v1045_v37 }
 0xf05   :  { %1049 = vrot.lane.b32.xlu0 %v1047_v39, %s1967_s2 }
 0xf06   :  { %v1069_v41 = vpop.permute.xlu1 %1068 }
 0xf07   :  { %v1071_v42 = vmul.f32 %v1790_v40, %v1069_v41 }
 0xf09   :  { %1073 = vrot.lane.b32.xlu1 %v1071_v42, %s1967_s2 }
 0xf77   :  { %v1050_v44 = vpop.permute.xlu0 %1049 }
 0xf78   :  { %v2257_v45 = vadd.f32 %v1050_v44, %v1042_v43 }
 0xf7a   :  { %1791 = vtanh.f32 %v2257_v45 }
 0xf7b   :  { %v1074_v47 = vpop.permute.xlu1 %1073 }
 0xf7c   :  { %v2261_v48 = vadd.f32 %v1074_v47, %v1066_v46 }
 0xf7e   :  { %1793 = vtanh.f32 %v2261_v48 }
 0xf87   :  { %v1792_v49 = vpop.eup %1791 }
 0xf88   :  { %1055 = vrot.lane.b32.xlu0 %v1792_v49, %s1962_s1  ;;  %v1257_v49 = vld [vmem:[#allocation3 + $0x7] sm:$0x1] }
 0xf8b   :  { %v1794_v51 = vpop.eup %1793 }
 0xf8c   :  { %1079 = vrot.lane.b32.xlu1 %v1794_v51, %s1962_s1  ;;  %v1258_v51 = vunpack.c.l.bf16 %v1257_v49 }
 0xffa   :  { %v1056_v52 = vpop.permute.xlu0 %1055 }
 0xffb   :  { %v2266_v54 = vmul.f32 %v1788_v36, %v1056_v52  ;;  %v1306_v52 = vld [vmem:[#allocation6] sm:$0x1] }
 0xffd   :  { %v1095_v55 = vpack.c.bf16 %v2266_v54, %v2266_v54 }
 0xffe   :  { %v1080_v56 = vpop.permute.xlu1 %1079 }
 0xfff   :  { %v2270_v58 = vmul.f32 %v1790_v40, %v1080_v56  ;;  %1100 = vrot.lane.b32.xlu0 %v1095_v55, %s1967_s2 }
0x1001   :  { %v1145_v57 = vpack.c.bf16 %v2270_v58, %v2270_v58 }
0x1003   :  { %1150 = vrot.lane.b32.xlu1 %v1145_v57, %s1967_s2  ;;  %v1307_v57 = vunpack.c.l.bf16 %v1306_v52 }
0x1071   :  { %v1101_v59 = vpop.permute.xlu0 %1100 }
0x1072   :  { %1653 = vmatmul.mubr.msk.bf16.vlgmr.msra.gmra.mxu0 %vm124_vm2, %v1101_v59 }
0x1073   :  { %1665 = vmatpush3.bf16.msra.mxu0 %v2032_v1  ;;  %1668 = vmatprep.mubr.msk.bf16.mxu0 %vm1966_vm1, %v1965_v0  ;;  %v1097_v1 = vld [vmem:[#allocation3 + $0x6] sm:$0x1] }
0x1074   :  { %1666 = vmatprep.subr.bf16.mxu0 %v1965_v0  ;;  %v1098_v62 = vunpack.c.l.bf16 %v1097_v1 }
0x1075   :  { %v1151_v60 = vpop.permute.xlu1 %1150 }
0x1076   :  { %1661 = vmatmul.mubr.msk.bf16.vlgmr.msra.gmra.mxu1 %vm124_vm2, %v1151_v60 }
0x1077   :  { %1673 = vmatpush3.bf16.msra.mxu1 %v2034_v2  ;;  %1667 = vmatpush3.bf16.msra.mxu0 %v2037_v3 }
0x1078   :  { %1674 = vmatprep.subr.bf16.mxu1 %v1965_v0  ;;  %1676 = vmatprep.mubr.msk.bf16.mxu1 %vm1966_vm1, %v1965_v0 }
0x107b   :  { %1675 = vmatpush3.bf16.msra.mxu1 %v2041_v4 }
0x1132   :  { %v1139_v6 = vpop.f32.mrf.mxu0 }
0x1133   :  { %v1140_v7 = vadd.f32 %v1139_v6, %v1098_v62 }
0x1134   :  { %v1654_v9 = vpop.f32.mrf.mxu0 }
0x1135   :  { %1795 = vtanh.f32 %v1140_v7  ;;  %v1498_v4 = vmul.f32 -1.442695, %v1140_v7 }
0x1136   :  { %v1142_v10 = vpop.f32.mrf.mxu0  ;;  %v1189_v12 = vpop.f32.mrf.mxu1 }
0x1137   :  { %v1190_v2 = vadd.f32 %v1189_v12, %v1148_v8 }
0x1138   :  { %v1655_v13 = vpop.f32.mrf.mxu0  ;;  %v1662_v3 = vpop.f32.mrf.mxu1 }
0x1139   :  { %1797 = vtanh.f32 %v1190_v2  ;;  %v1499_v18 = vmul.f32 -1.442695, %v1190_v2 }
0x113a   :  { %v1192_v15 = vpop.f32.mrf.mxu1  ;;  %1799 = vpow2.f32 %v1498_v4 }
0x113b   :  { %1801 = vpow2.f32 %v1499_v18 }
0x113c   :  { %v1663_v16 = vpop.f32.mrf.mxu1 }
0x1142   :  { %v1796_v17 = vpop.eup %1795 }
0x1143   :  { %1204 = vrot.lane.b32.xlu0 %v1796_v17, %s1962_s1 }
0x1146   :  { %v1798_v0 = vpop.eup %1797 }
0x1147   :  { %1228 = vrot.lane.b32.xlu1 %v1798_v0, %s1962_s1  ;;  %v1800_v19 = vpop.eup %1799 }
0x1148   :  { %v1198_v20 = vadd.f32 1.0, %v1800_v19  ;;  %v1802_v21 = vpop.eup %1801 }
0x1149   :  { %v1222_v23 = vadd.f32 1.0, %v1802_v21 }
0x114a   :  { %1803 = vrcp.f32 %v1198_v20 }
0x114b   :  { %1805 = vrcp.f32 %v1222_v23 }
0x1157   :  { %v1804_v24 = vpop.eup %1803 }
0x1158   :  { %v1806_v28 = vpop.eup %1805  ;;  %v1202_v31 = vmul.f32 %v1804_v24, %v2257_v45 }
0x1159   :  { %v1226_v34 = vmul.f32 %v1806_v28, %v2261_v48 }
0x11b5   :  { %v1205_v26 = vpop.permute.xlu0 %1204 }
0x11b6   :  { %v1207_v27 = vmul.f32 %v1804_v24, %v1205_v26 }
0x11b8   :  { %1209 = vrot.lane.b32.xlu0 %v1207_v27, %s1967_s2 }
0x11b9   :  { %v1229_v29 = vpop.permute.xlu1 %1228 }
0x11ba   :  { %v1231_v30 = vmul.f32 %v1806_v28, %v1229_v29 }
0x11bc   :  { %1233 = vrot.lane.b32.xlu1 %v1231_v30, %s1967_s2 }
0x122a   :  { %v1210_v32 = vpop.permute.xlu0 %1209 }
0x122b   :  { %v1212_v33 = vadd.f32 %v1210_v32, %v1202_v31 }
0x122d   :  { %1807 = vtanh.f32 %v1212_v33 }
0x122e   :  { %v1234_v36 = vpop.permute.xlu1 %1233 }
0x122f   :  { %v1236_v37 = vadd.f32 %v1234_v36, %v1226_v34 }
0x1231   :  { %1809 = vtanh.f32 %v1236_v37 }
0x123a   :  { %v1808_v39 = vpop.eup %1807 }
0x123b   :  { %1215 = vrot.lane.b32.xlu0 %v1808_v39, %s1962_s1 }
0x123e   :  { %v1810_v40 = vpop.eup %1809 }
0x123f   :  { %1239 = vrot.lane.b32.xlu1 %v1810_v40, %s1962_s1 }
0x12ad   :  { %v1216_v41 = vpop.permute.xlu0 %1215 }
0x12ae   :  { %v2296_v42 = vmul.f32 %v1804_v24, %v1216_v41 }
0x12b0   :  { %v1255_v43 = vpack.c.bf16 %v2296_v42, %v2296_v42 }
0x12b1   :  { %v1240_v44 = vpop.permute.xlu1 %1239 }
0x12b2   :  { %v2300_v45 = vmul.f32 %v1806_v28, %v1240_v44  ;;  %1260 = vrot.lane.b32.xlu0 %v1255_v43, %s1967_s2 }
0x12b4   :  { %v1305_v46 = vpack.c.bf16 %v2300_v45, %v2300_v45 }
0x12b6   :  { %1309 = vrot.lane.b32.xlu1 %v1305_v46, %s1967_s2 }
0x1324   :  { %v1261_v47 = vpop.permute.xlu0 %1260 }
0x1325   :  { %1669 = vmatmul.mubr.msk.bf16.vlgmr.msra.gmra.mxu0 %vm124_vm2, %v1261_v47 }
0x1328   :  { %v1310_v48 = vpop.permute.xlu1 %1309 }
0x1329   :  { %1677 = vmatmul.mubr.msk.bf16.vlgmr.msra.gmra.mxu1 %vm124_vm2, %v1310_v48 }
0x13e5   :  { %v1299_v55 = vpop.f32.mrf.mxu0 }
0x13e6   :  { %v1300_v56 = vadd.f32 %v1299_v55, %v1258_v51 }
0x13e7   :  { %v1670_v59 = vpop.f32.mrf.mxu0 }
0x13e8   :  { %1811 = vtanh.f32 %v1300_v56  ;;  %v1502_v12 = vmul.f32 -1.442695, %v1300_v56 }
0x13e9   :  { %v1302_v60 = vpop.f32.mrf.mxu0  ;;  %v1348_v1 = vpop.f32.mrf.mxu1 }
0x13ea   :  { %v1349_v62 = vadd.f32 %v1348_v1, %v1307_v57 }
0x13eb   :  { %v1671_v63 = vpop.f32.mrf.mxu0  ;;  %v1678_v6 = vpop.f32.mrf.mxu1 }
0x13ec   :  { %1813 = vtanh.f32 %v1349_v62  ;;  %v1503_v2 = vmul.f32 -1.442695, %v1349_v62 }
0x13ed   :  { %v1351_v7 = vpop.f32.mrf.mxu1  ;;  %1815 = vpow2.f32 %v1502_v12 }
0x13ee   :  { %1817 = vpow2.f32 %v1503_v2 }
0x13ef   :  { %v1679_v8 = vpop.f32.mrf.mxu1 }
0x13f5   :  { %v1812_v9 = vpop.eup %1811 }
0x13f6   :  { %1363 = vrot.lane.b32.xlu0 %v1812_v9, %s1962_s1 }
0x13f9   :  { %v1814_v10 = vpop.eup %1813 }
0x13fa   :  { %1387 = vrot.lane.b32.xlu1 %v1814_v10, %s1962_s1  ;;  %v1816_v13 = vpop.eup %1815 }
0x13fb   :  { %v1357_v3 = vadd.f32 1.0, %v1816_v13  ;;  %v1818_v15 = vpop.eup %1817 }
0x13fc   :  { %v1381_v16 = vadd.f32 1.0, %v1818_v15 }
0x13fd   :  { %1819 = vrcp.f32 %v1357_v3 }
0x13fe   :  { %1821 = vrcp.f32 %v1381_v16 }
0x140a   :  { %v1820_v17 = vpop.eup %1819 }
0x140b   :  { %v1822_v18 = vpop.eup %1821  ;;  %v1361_v21 = vmul.f32 %v1820_v17, %v1212_v33 }
0x140c   :  { %v1385_v26 = vmul.f32 %v1822_v18, %v1236_v37 }
0x1468   :  { %v1364_v0 = vpop.permute.xlu0 %1363 }
0x1469   :  { %v1366_v4 = vmul.f32 %v1820_v17, %v1364_v0 }
0x146b   :  { %1368 = vrot.lane.b32.xlu0 %v1366_v4, %s1967_s2 }
0x146c   :  { %v1388_v19 = vpop.permute.xlu1 %1387 }
0x146d   :  { %v1390_v20 = vmul.f32 %v1822_v18, %v1388_v19 }
0x146f   :  { %1392 = vrot.lane.b32.xlu1 %v1390_v20, %s1967_s2 }
0x14dd   :  { %v1369_v23 = vpop.permute.xlu0 %1368 }
0x14de   :  { %v1371_v24 = vadd.f32 %v1369_v23, %v1361_v21 }
0x14e0   :  { %1823 = vtanh.f32 %v1371_v24 }
0x14e1   :  { %v1393_v27 = vpop.permute.xlu1 %1392 }
0x14e2   :  { %v1395_v28 = vadd.f32 %v1393_v27, %v1385_v26 }
0x14e4   :  { %1825 = vtanh.f32 %v1395_v28 }
0x14ed   :  { %v1824_v29 = vpop.eup %1823 }
0x14ee   :  { %1374 = vrot.lane.b32.xlu0 %v1824_v29, %s1962_s1 }
0x14f1   :  { %v1826_v30 = vpop.eup %1825 }
0x14f2   :  { %1398 = vrot.lane.b32.xlu1 %v1826_v30, %s1962_s1  ;;  %284 = vrot.lane.b32.xlu0 %v2076_v50, %s1967_s2 }
0x14f6   :  { %290 = vrot.lane.b32.xlu1 %v2080_v53, %s1967_s2  ;;  %444 = vrot.lane.b32.xlu0 %v2114_v35, %s1967_s2 }
0x14fa   :  { %450 = vrot.lane.b32.xlu1 %v2118_v38, %s1967_s2  ;;  %604 = vrot.lane.b32.xlu0 %v2152_v22, %s1967_s2 }
0x14fe   :  { %610 = vrot.lane.b32.xlu1 %v2156_v25, %s1967_s2  ;;  %764 = vrot.lane.b32.xlu0 %v2190_v11, %s1967_s2 }
0x1502   :  { %770 = vrot.lane.b32.xlu1 %v2194_v14, %s1967_s2  ;;  %924 = vrot.lane.b32.xlu0 %v2228_v61, %s1967_s2 }
0x1506   :  { %930 = vrot.lane.b32.xlu1 %v2232_v5, %s1967_s2  ;;  %1084 = vrot.lane.b32.xlu0 %v2266_v54, %s1967_s2 }
0x150a   :  { %1090 = vrot.lane.b32.xlu1 %v2270_v58, %s1967_s2  ;;  %1244 = vrot.lane.b32.xlu0 %v2296_v42, %s1967_s2 }
0x150e   :  { %1250 = vrot.lane.b32.xlu1 %v2300_v45, %s1967_s2 }
0x1560   :  { %v1375_v50 = vpop.permute.xlu0 %1374 }
0x1561   :  { %v1377_v53 = vmul.f32 %v1820_v17, %v1375_v50 }
0x1563   :  { %1403 = vrot.lane.b32.xlu0 %v1377_v53, %s1967_s2 }
0x1564   :  { %v1399_v35 = vpop.permute.xlu1 %1398  ;;  %v285_v38 = vpop.permute.xlu0 %284 }
0x1565   :  { %v1401_v22 = vmul.f32 %v1822_v18, %v1399_v35  ;;  %288 = vst.msk [vmem:[#allocation11] sm:$0x3] %vm89_vm0, %v285_v38 }
0x1567   :  { %1409 = vrot.lane.b32.xlu1 %v1401_v22, %s1967_s2  ;;  %1416 = vrot.lane.b32.xlu0 %v1371_v24, %s1968_s3 }
0x1568   :  { %v291_v25 = vpop.permute.xlu1 %290  ;;  %v445_v11 = vpop.permute.xlu0 %444 }
0x1569   :  { %294 = vst.msk [vmem:[#allocation12 + $0xe] sm:$0x3] %vm89_vm0, %v291_v25  ;;  %448 = vst.msk [vmem:[#allocation11 + $0x2] sm:$0x3] %vm89_vm0, %v445_v11 }
0x156b   :  { %1421 = vrot.lane.b32.xlu1 %v1395_v28, %s1968_s3 }
0x156c   :  { %v451_v14 = vpop.permute.xlu1 %450  ;;  %v605_v61 = vpop.permute.xlu0 %604 }
0x156d   :  { %454 = vst.msk [vmem:[#allocation12 + $0xc] sm:$0x3] %vm89_vm0, %v451_v14  ;;  %608 = vst.msk [vmem:[#allocation11 + $0x4] sm:$0x3] %vm89_vm0, %v605_v61 }
0x1570   :  { %v611_v5 = vpop.permute.xlu1 %610  ;;  %v765_v54 = vpop.permute.xlu0 %764 }
0x1571   :  { %614 = vst.msk [vmem:[#allocation12 + $0xa] sm:$0x3] %vm89_vm0, %v611_v5  ;;  %768 = vst.msk [vmem:[#allocation11 + $0x6] sm:$0x3] %vm89_vm0, %v765_v54 }
0x1574   :  { %v771_v58 = vpop.permute.xlu1 %770  ;;  %v925_v31 = vpop.permute.xlu0 %924 }
0x1575   :  { %774 = vst.msk [vmem:[#allocation12 + $0x8] sm:$0x3] %vm89_vm0, %v771_v58  ;;  %928 = vst.msk [vmem:[#allocation11 + $0x8] sm:$0x3] %vm89_vm0, %v925_v31 }
0x1578   :  { %v931_v32 = vpop.permute.xlu1 %930  ;;  %v1085_v33 = vpop.permute.xlu0 %1084 }
0x1579   :  { %934 = vst.msk [vmem:[#allocation12 + $0x6] sm:$0x3] %vm89_vm0, %v931_v32  ;;  %1088 = vst.msk [vmem:[#allocation11 + $0xa] sm:$0x3] %vm89_vm0, %v1085_v33 }
0x157c   :  { %v1091_v34 = vpop.permute.xlu1 %1090  ;;  %v1245_v36 = vpop.permute.xlu0 %1244 }
0x157d   :  { %1094 = vst.msk [vmem:[#allocation12 + $0x4] sm:$0x3] %vm89_vm0, %v1091_v34  ;;  %1248 = vst.msk [vmem:[#allocation11 + $0xc] sm:$0x3] %vm89_vm0, %v1245_v36 }
0x1580   :  { %v1251_v37 = vpop.permute.xlu1 %1250 }
0x1581   :  { %1254 = vst.msk [vmem:[#allocation12 + $0x2] sm:$0x3] %vm89_vm0, %v1251_v37 }
0x15d5   :  { %v1404_v39 = vpop.permute.xlu0 %1403 }
0x15d6   :  { %1407 = vst.msk [vmem:[#allocation11 + $0xe] sm:$0x3] %vm89_vm0, %v1404_v39  ;;  %1413 = vst.msk [vmem:[#allocation2] sm:$0x3] %vm89_vm0, %v1404_v39 }
0x15d7   :  { %1918 = shalt.err (!%p1915_p10)
}
0x15d8   :  { %s1971_s20 = smov 2   ;;  %s1927_s23 = scalar_lea.vmem %s1447_s18, 256 }
0x15d9   :  { %1436 = dma.vmem_to_hbm [thread:$0]  %s1431_s16, 256, %s2378_s4, [#allocation5], %s1967_s2, %s1967_s2, %s1971_s20   ;;  %v1410_v40 = vpop.permute.xlu1 %1409  ;;  %v1417_v41 = vpop.permute.xlu0 %1416 }
0x15da   :  { %1412 = vst.msk [vmem:[#allocation12] sm:$0x3] %vm89_vm0, %v1410_v40  ;;  %1414 = vst.msk [vmem:[#allocation2 + $0x2] sm:$0x3] %vm89_vm0, %v1410_v40  ;;  %p1928_p11 = scmp.ne.s32.totalorder %s1447_s18, %s1927_s23  ;;  %p1932_p12 = scmp.lt.s32.totalorder %s1447_s18, %s1447_s18 }
0x15db   :  { %1419 = vst.msk [vmem:[#allocation2 + $0x4] sm:$0x3] %vm89_vm0, %v1417_v41  ;;  %p1933_p13 = scmp.lt.s32.totalorder %s1927_s23, %s1927_s23 }
0x15dd   :  { %p1934_p0 = por %p1933_p13, %p1932_p12 }
0x15df   :  { %p1935_p1 = pnand %p1934_p0, %p1928_p11 }
0x15e1   :  { %1938 = shalt.err (!%p1935_p1)
}
0x15e2   :  { %1452 = dma.vmem_to_hbm [thread:$0]  %s1447_s18, 256, %s2379_s5, [#allocation13], %s1967_s2, %s1967_s2, %s1971_s20   ;;  %v1422_v42 = vpop.permute.xlu1 %1421 }
0x15e3   :  { %1424 = vst.msk [vmem:[#allocation2 + $0x6] sm:$0x3] %vm89_vm0, %v1422_v42 }
0x15e4   :  { %1953 = dma.done.wait [#allocation5], 256  }
0x15e5   :  { %1954 = vsyncadd [#allocation5], 4294967040 }
0x15e6   :  { %1955 = dma.done.wait [#allocation13], 256  }
0x15e7   :  { %1956 = vsyncadd [#allocation13], 4294967040 }
0x15e8   :  { %1459 = vsyncpa [#allocation4], 1 }
0x15e9   :  { %1460 = vsyncpa [#allocation7], 1 }
0x15ea   :  { %1461 = vsyncpa [#allocation10], 1 }
0x15eb   :  { %1462 = vsyncpa [#allocation5], 1 }
0x15ec   :  { %1463 = vsyncpa [#allocation13], 1 }

</bundles_post_ra>
